<compile_context>
chip_gen: v7x
topology: tpu7x:2x2x1
jax: 0.10.0
libtpu: 0.0.40
codegen_flags: <defaults>
</compile_context>

<pallas_src>
import jax
import jax.numpy as jnp
from jax.experimental import pallas as pl
from jax.experimental.pallas import tpu as pltpu  # noqa: F401


# ----------------------------- fused model kernel -----------------------------
def _fused_lstm_linear_kernel(x_ref, wih0_ref, whh0_ref, b0_ref,
                              wih1_ref, whh1_ref, b1_ref,
                              wlin_ref, blin_ref, h0_ref, c0_ref,
                              pre_ref, state_ref):
    Bp = h0_ref.shape[1]            # padded batch (multiple of 8 sublanes)
    H = h0_ref.shape[2]
    T = x_ref.shape[0] // Bp        # static

    def cell(gates, c):
        # g-gate pre-activations were pre-scaled by 2 in the wrapper, so one
        # full-vreg sigmoid serves all 4 gates: tanh(z) = 2*sigmoid(2z) - 1.
        sig = jax.nn.sigmoid(gates)
        i_g = sig[:, 0:H]
        f_g = sig[:, H:2 * H]
        g_g = 2.0 * sig[:, 2 * H:3 * H] - 1.0
        o_g = sig[:, 3 * H:4 * H]
        c_new = f_g * c + i_g * g_g
        h_new = o_g * jnp.tanh(c_new)
        return h_new, c_new

    # Layer-0 input projection hoisted out of the recurrence: one big MXU op
    # off the serial critical path. (x and weights are bf16, accumulate f32.)
    gx0 = jnp.dot(x_ref[...], wih0_ref[...],
                  preferred_element_type=jnp.float32) + b0_ref[...]

    whh0 = whh0_ref[...]
    wih1 = wih1_ref[...]
    whh1 = whh1_ref[...]
    b1 = jnp.broadcast_to(b1_ref[...], (Bp, 4 * H))   # hoisted broadcast

    hA = h0_ref[0]                  # layer-0 state, f32 (Bp, H)
    cA = c0_ref[0]
    hB = h0_ref[1]                  # layer-1 state
    cB = c0_ref[1]
    hA_bf = hA.astype(jnp.bfloat16)
    hB_bf = hB.astype(jnp.bfloat16)

    h2s = []

    # --- prologue: layer-0 step 0 ---
    gatesA = gx0[0:Bp, :] + jnp.dot(hA_bf, whh0,
                                    preferred_element_type=jnp.float32)
    hA, cA = cell(gatesA, cA)
    hA_bf = hA.astype(jnp.bfloat16)

    # --- steady state: layer-0 step t interleaved with layer-1 step t-1.
    #     The two gate computations below only read last-iteration state, so
    #     they form two independent chains whose MXU/EUP latencies overlap. ---
    for t in range(1, T):           # T is small & static -> full unroll
        gatesA = gx0[t * Bp:(t + 1) * Bp, :] + jnp.dot(
            hA_bf, whh0, preferred_element_type=jnp.float32)
        gatesB = (jnp.dot(hA_bf, wih1, preferred_element_type=jnp.float32)
                  + jnp.dot(hB_bf, whh1, preferred_element_type=jnp.float32)
                  + b1)
        hA, cA = cell(gatesA, cA)   # layer-0 step t
        hB, cB = cell(gatesB, cB)   # layer-1 step t-1
        h2s.append(hB)
        hA_bf = hA.astype(jnp.bfloat16)
        hB_bf = hB.astype(jnp.bfloat16)

    # --- epilogue: layer-1 step T-1 ---
    gatesB = (jnp.dot(hA_bf, wih1, preferred_element_type=jnp.float32)
              + jnp.dot(hB_bf, whh1, preferred_element_type=jnp.float32)
              + b1)
    hB, cB = cell(gatesB, cB)
    h2s.append(hB)

    # Dropout(0.3) is identity at inference; fused Linear over all timesteps.
    # TODO(synk): training-mode stochastic dropout (pltpu.prng_*) not implemented.
    h2_all = jnp.concatenate(h2s, axis=0)                      # (T*Bp, H)
    pre_ref[...] = jnp.dot(h2_all.astype(jnp.bfloat16), wlin_ref[...],
                           preferred_element_type=jnp.float32) + blin_ref[...]

    # Final per-layer states packed into one lane-dense (Bp, 4H)=(8,128) slab:
    # [ h_layer0 | h_layer1 | c_layer0 | c_layer1 ]
    state_ref[:, 0:H] = hA
    state_ref[:, H:2 * H] = hB
    state_ref[:, 2 * H:3 * H] = cA
    state_ref[:, 3 * H:4 * H] = cB


# ------------------------------ Model forward ---------------------------------
def _scale_g_gate(w, H):
    # Pre-scale the candidate(g) gate block by 2 so the kernel can use
    # tanh(z) = 2*sigmoid(2z) - 1 with a single full-vreg sigmoid.
    return w.at[..., 2 * H:3 * H].multiply(2.0)


@jax.jit
def mymodel_forward(params, xs_embedding, h_0=None, c_0=None):
    B, T, E = xs_embedding.shape
    H = params["whh0"].shape[0]
    V = params["w_lin"].shape[-1]
    Bp = ((B + 7) // 8) * 8                                   # sublane padding

    if h_0 is None or c_0 is None:
        h_0 = jnp.zeros((2, B, H), jnp.float32)
        c_0 = jnp.zeros((2, B, H), jnp.float32)

    # Input layout prep (time-major, batch padded, flattened). Under jit these
    # fuse into one tiny op; the kernel then works on aligned full-vreg slices.
    x_tm = jnp.transpose(xs_embedding, (1, 0, 2))             # (T, B, E)
    x_tm = jnp.pad(x_tm, ((0, 0), (0, Bp - B), (0, 0)))       # (T, Bp, E)
    x_flat = x_tm.reshape(T * Bp, E).astype(jnp.bfloat16)
    h0_p = jnp.pad(h_0, ((0, 0), (0, Bp - B), (0, 0)))        # (2, Bp, H)
    c0_p = jnp.pad(c_0, ((0, 0), (0, Bp - B), (0, 0)))

    # Kernel-form weights: g-gate pre-scaled; bf16 MXU inputs, f32 biases.
    wih0 = _scale_g_gate(params["wih0"], H).astype(jnp.bfloat16)
    whh0 = _scale_g_gate(params["whh0"], H).astype(jnp.bfloat16)
    b0 = _scale_g_gate(params["b0"], H)
    wih1 = _scale_g_gate(params["wih1"], H).astype(jnp.bfloat16)
    whh1 = _scale_g_gate(params["whh1"], H).astype(jnp.bfloat16)
    b1 = _scale_g_gate(params["b1"], H)
    w_lin = params["w_lin"].astype(jnp.bfloat16)
    b_lin = params["b_lin"].reshape(1, V)

    pre_p, state = pl.pallas_call(
        _fused_lstm_linear_kernel,
        out_shape=[
            jax.ShapeDtypeStruct((T * Bp, V), jnp.float32),   # pre (time-major)
            jax.ShapeDtypeStruct((Bp, 4 * H), jnp.float32),   # packed h_n/c_n
        ],
    )(x_flat, wih0, whh0, b0, wih1, whh1, b1, w_lin, b_lin, h0_p, c0_p)

    # Kernel output row = t*Bp + b; Flatten(0,1) of batch-first (B,T,H) expects
    # row = b*T + t. Restore that order (fused with the batch un-pad under jit).
    pre = jnp.transpose(pre_p.reshape(T, Bp, V), (1, 0, 2))[:B].reshape(B * T, V)
    h_n = jnp.stack([state[:B, 0:H], state[:B, H:2 * H]])
    c_n = jnp.stack([state[:B, 2 * H:3 * H], state[:B, 3 * H:4 * H]])
    return pre, (h_n, c_n)


# ----------------------- Deterministic parameter init ------------------------
def init_params(key, embedding_num, hidden_num, word_size):
    H, E, V = hidden_num, embedding_num, word_size
    ks = jax.random.split(key, 12)
    s_lstm = 1.0 / jnp.sqrt(H)
    s_lin = 1.0 / jnp.sqrt(H)

    def u(k, shape, s):
        return jax.random.uniform(k, shape, jnp.float32, -s, s)

    # layer 0: input size E; layer 1: input size H; gate order [i, f, g, o]
    wih0 = u(ks[0], (4 * H, E), s_lstm)
    whh0 = u(ks[1], (4 * H, H), s_lstm)
    b0 = u(ks[2], (4 * H,), s_lstm) + u(ks[3], (4 * H,), s_lstm)
    wih1 = u(ks[4], (4 * H, H), s_lstm)
    whh1 = u(ks[5], (4 * H, H), s_lstm)
    b1 = u(ks[6], (4 * H,), s_lstm) + u(ks[7], (4 * H,), s_lstm)
    w_lin = u(ks[8], (V, H), s_lin)
    b_lin = u(ks[9], (V,), s_lin)

    return {
        "hidden_num": H,
        "wih0": wih0.T, "whh0": whh0.T, "b0": b0.reshape(1, 4 * H),
        "wih1": wih1.T, "whh1": whh1.T, "b1": b1.reshape(1, 4 * H),
        "w_lin": w_lin.T, "b_lin": b_lin,
    }


# ----------------------------- Pure-JAX reference -----------------------------
def _lstm_layer_ref(x_tm, wih_t, whh_t, b2d, h0, c0):
    H = h0.shape[-1]

    def step(carry, x_t):
        h, c = carry
        g = x_t @ wih_t + h @ whh_t + b2d[0]
        i = jax.nn.sigmoid(g[:, 0:H])
        f = jax.nn.sigmoid(g[:, H:2 * H])
        gg = jnp.tanh(g[:, 2 * H:3 * H])
        o = jax.nn.sigmoid(g[:, 3 * H:4 * H])
        c = f * c + i * gg
        h = o * jnp.tanh(c)
        return (h, c), h

    (h, c), hs = jax.lax.scan(step, (h0, c0), x_tm)
    return hs, h, c


def mymodel_ref(params, xs_embedding):
    B, T, E = xs_embedding.shape
    H = params["hidden_num"]
    x_tm = jnp.transpose(xs_embedding, (1, 0, 2))
    z = jnp.zeros((B, H), jnp.float32)
    hid1, h1, c1 = _lstm_layer_ref(x_tm, params["wih0"], params["whh0"],
                                   params["b0"], z, z)
    hid2, h2, c2 = _lstm_layer_ref(hid1, params["wih1"], params["whh1"],
                                   params["b1"], z, z)
    flat = jnp.transpose(hid2, (1, 0, 2)).reshape(B * T, H)
    pre = flat @ params["w_lin"] + params["b_lin"]
    return pre, (jnp.stack([h1, h2]), jnp.stack([c1, c2]))


# ----------------------------------- main --------------------------------------
if __name__ == "__main__":
    B, T = 2, 8
    embedding_num, hidden_num, word_size = 32, 32, 64

    key = jax.random.PRNGKey(0)
    k_param, k_x = jax.random.split(key)
    params = init_params(k_param, embedding_num, hidden_num, word_size)
    xs_embedding = jax.random.normal(k_x, (B, T, embedding_num), jnp.float32)

    pre, (h_n, c_n) = mymodel_forward(params, xs_embedding)
    pre = jax.block_until_ready(pre)
    h_n = jax.block_until_ready(h_n)
    c_n = jax.block_until_ready(c_n)

    # sanity: shapes + numerical match against the pure-f32 JAX reference.
    # Tolerance is widened to 2e-2 because the kernel uses bf16 MXU inputs
    # (f32 accumulation); observed error is ~1e-3, structural bugs are >>2e-2.
    assert pre.shape == (B * T, word_size)
    assert h_n.shape == (2, B, hidden_num) and c_n.shape == (2, B, hidden_num)
    pre_r, (h_r, c_r) = mymodel_ref(params, xs_embedding)
    assert jnp.allclose(pre, pre_r, atol=2e-2, rtol=2e-2)
    assert jnp.allclose(h_n, h_r, atol=2e-2, rtol=2e-2)
    assert jnp.allclose(c_n, c_r, atol=2e-2, rtol=2e-2)

    print("KERNEL_OK")
</pallas_src>

<mosaic_0001>
module attributes {stable_mosaic.version = 11 : i64} {
  func.func @_fused_lstm_linear_kernel(%arg0: memref<64x32xbf16, #tpu.memory_space<vmem>>, %arg1: memref<32x128xbf16, #tpu.memory_space<vmem>>, %arg2: memref<32x128xbf16, #tpu.memory_space<vmem>>, %arg3: memref<1x128xf32, #tpu.memory_space<vmem>>, %arg4: memref<32x128xbf16, #tpu.memory_space<vmem>>, %arg5: memref<32x128xbf16, #tpu.memory_space<vmem>>, %arg6: memref<1x128xf32, #tpu.memory_space<vmem>>, %arg7: memref<32x64xbf16, #tpu.memory_space<vmem>>, %arg8: memref<1x64xf32, #tpu.memory_space<vmem>>, %arg9: memref<2x8x32xf32, #tpu.memory_space<vmem>>, %arg10: memref<2x8x32xf32, #tpu.memory_space<vmem>>, %arg11: memref<64x64xf32, #tpu.memory_space<vmem>>, %arg12: memref<8x128xf32, #tpu.memory_space<vmem>>) attributes {dimension_semantics = [], scalar_prefetch = 0 : i64, scratch_operands = 0 : i64, tpu.core_type = #tpu.core_type<tc>} {
    %c0 = arith.constant 0 : index
    %c0_0 = arith.constant 0 : index
    %0 = vector.load %arg0[%c0, %c0_0] : memref<64x32xbf16, #tpu.memory_space<vmem>>, vector<64x32xbf16>
    %c0_1 = arith.constant 0 : index
    %c0_2 = arith.constant 0 : index
    %1 = vector.load %arg1[%c0_1, %c0_2] : memref<32x128xbf16, #tpu.memory_space<vmem>>, vector<32x128xbf16>
    %cst = arith.constant dense<0.000000e+00> : vector<64x128xf32>
    %2 = tpu.matmul %0, %1, %cst {dimension_numbers = #tpu.dot_dimension_numbers<[1], [0], [0], [1], [0, 0, 1, 1], [], []>} : vector<64x32xbf16>, vector<32x128xbf16>, vector<64x128xf32> -> vector<64x128xf32>
    %c0_3 = arith.constant 0 : index
    %c0_4 = arith.constant 0 : index
    %3 = vector.load %arg3[%c0_3, %c0_4] : memref<1x128xf32, #tpu.memory_space<vmem>>, vector<1x128xf32>
    %4 = vector.broadcast %3 : vector<1x128xf32> to vector<64x128xf32>
    %5 = arith.addf %2, %4 : vector<64x128xf32>
    %c0_5 = arith.constant 0 : index
    %c0_6 = arith.constant 0 : index
    %6 = vector.load %arg2[%c0_5, %c0_6] : memref<32x128xbf16, #tpu.memory_space<vmem>>, vector<32x128xbf16>
    %c0_7 = arith.constant 0 : index
    %c0_8 = arith.constant 0 : index
    %7 = vector.load %arg4[%c0_7, %c0_8] : memref<32x128xbf16, #tpu.memory_space<vmem>>, vector<32x128xbf16>
    %c0_9 = arith.constant 0 : index
    %c0_10 = arith.constant 0 : index
    %8 = vector.load %arg5[%c0_9, %c0_10] : memref<32x128xbf16, #tpu.memory_space<vmem>>, vector<32x128xbf16>
    %c0_11 = arith.constant 0 : index
    %c0_12 = arith.constant 0 : index
    %9 = vector.load %arg6[%c0_11, %c0_12] : memref<1x128xf32, #tpu.memory_space<vmem>>, vector<1x128xf32>
    %10 = vector.shape_cast %9 : vector<1x128xf32> to vector<1x128xf32>
    %11 = vector.broadcast %10 : vector<1x128xf32> to vector<8x128xf32>
    %c0_13 = arith.constant 0 : index
    %c0_14 = arith.constant 0 : index
    %c0_15 = arith.constant 0 : index
    %12 = vector.load %arg9[%c0_13, %c0_14, %c0_15] : memref<2x8x32xf32, #tpu.memory_space<vmem>>, vector<1x8x32xf32>
    %13 = vector.shape_cast %12 : vector<1x8x32xf32> to vector<8x32xf32>
    %c0_16 = arith.constant 0 : index
    %c0_17 = arith.constant 0 : index
    %c0_18 = arith.constant 0 : index
    %14 = vector.load %arg10[%c0_16, %c0_17, %c0_18] : memref<2x8x32xf32, #tpu.memory_space<vmem>>, vector<1x8x32xf32>
    %15 = vector.shape_cast %14 : vector<1x8x32xf32> to vector<8x32xf32>
    %c1 = arith.constant 1 : index
    %c0_19 = arith.constant 0 : index
    %c0_20 = arith.constant 0 : index
    %16 = vector.load %arg9[%c1, %c0_19, %c0_20] : memref<2x8x32xf32, #tpu.memory_space<vmem>>, vector<1x8x32xf32>
    %17 = vector.shape_cast %16 : vector<1x8x32xf32> to vector<8x32xf32>
    %c1_21 = arith.constant 1 : index
    %c0_22 = arith.constant 0 : index
    %c0_23 = arith.constant 0 : index
    %18 = vector.load %arg10[%c1_21, %c0_22, %c0_23] : memref<2x8x32xf32, #tpu.memory_space<vmem>>, vector<1x8x32xf32>
    %19 = vector.shape_cast %18 : vector<1x8x32xf32> to vector<8x32xf32>
    %20 = arith.truncf %13 : vector<8x32xf32> to vector<8x32xbf16>
    %21 = arith.truncf %17 : vector<8x32xf32> to vector<8x32xbf16>
    %22 = vector.extract_strided_slice %5 {offsets = [0, 0], sizes = [8, 128], strides = [1, 1]} : vector<64x128xf32> to vector<8x128xf32>
    %cst_24 = arith.constant dense<0.000000e+00> : vector<8x128xf32>
    %23 = tpu.matmul %20, %6, %cst_24 {dimension_numbers = #tpu.dot_dimension_numbers<[1], [0], [0], [1], [0, 0, 1, 1], [], []>} : vector<8x32xbf16>, vector<32x128xbf16>, vector<8x128xf32> -> vector<8x128xf32>
    %24 = arith.addf %22, %23 : vector<8x128xf32>
    %25 = arith.negf %24 : vector<8x128xf32>
    %26 = math.exp %25 : vector<8x128xf32>
    %cst_25 = arith.constant 1.000000e+00 : f32
    %27 = vector.broadcast %cst_25 : f32 to vector<8x128xf32>
    %28 = arith.addf %27, %26 : vector<8x128xf32>
    %29 = arith.divf %27, %28 : vector<8x128xf32>
    %30 = vector.extract_strided_slice %29 {offsets = [0, 0], sizes = [8, 32], strides = [1, 1]} : vector<8x128xf32> to vector<8x32xf32>
    %31 = vector.extract_strided_slice %29 {offsets = [0, 32], sizes = [8, 32], strides = [1, 1]} : vector<8x128xf32> to vector<8x32xf32>
    %32 = vector.extract_strided_slice %29 {offsets = [0, 64], sizes = [8, 32], strides = [1, 1]} : vector<8x128xf32> to vector<8x32xf32>
    %cst_26 = arith.constant 2.000000e+00 : f32
    %33 = vector.broadcast %cst_26 : f32 to vector<8x32xf32>
    %34 = arith.mulf %33, %32 : vector<8x32xf32>
    %cst_27 = arith.constant 1.000000e+00 : f32
    %35 = vector.broadcast %cst_27 : f32 to vector<8x32xf32>
    %36 = arith.subf %34, %35 : vector<8x32xf32>
    %37 = vector.extract_strided_slice %29 {offsets = [0, 96], sizes = [8, 32], strides = [1, 1]} : vector<8x128xf32> to vector<8x32xf32>
    %38 = arith.mulf %31, %15 : vector<8x32xf32>
    %39 = arith.mulf %30, %36 : vector<8x32xf32>
    %40 = arith.addf %38, %39 : vector<8x32xf32>
    %41 = math.tanh %40 : vector<8x32xf32>
    %42 = arith.mulf %37, %41 : vector<8x32xf32>
    %43 = arith.truncf %42 : vector<8x32xf32> to vector<8x32xbf16>
    %44 = vector.extract_strided_slice %5 {offsets = [8, 0], sizes = [8, 128], strides = [1, 1]} : vector<64x128xf32> to vector<8x128xf32>
    %cst_28 = arith.constant dense<0.000000e+00> : vector<8x128xf32>
    %45 = tpu.matmul %43, %6, %cst_28 {dimension_numbers = #tpu.dot_dimension_numbers<[1], [0], [0], [1], [0, 0, 1, 1], [], []>} : vector<8x32xbf16>, vector<32x128xbf16>, vector<8x128xf32> -> vector<8x128xf32>
    %46 = arith.addf %44, %45 : vector<8x128xf32>
    %cst_29 = arith.constant dense<0.000000e+00> : vector<8x128xf32>
    %47 = tpu.matmul %43, %7, %cst_29 {dimension_numbers = #tpu.dot_dimension_numbers<[1], [0], [0], [1], [0, 0, 1, 1], [], []>} : vector<8x32xbf16>, vector<32x128xbf16>, vector<8x128xf32> -> vector<8x128xf32>
    %cst_30 = arith.constant dense<0.000000e+00> : vector<8x128xf32>
    %48 = tpu.matmul %21, %8, %cst_30 {dimension_numbers = #tpu.dot_dimension_numbers<[1], [0], [0], [1], [0, 0, 1, 1], [], []>} : vector<8x32xbf16>, vector<32x128xbf16>, vector<8x128xf32> -> vector<8x128xf32>
    %49 = arith.addf %47, %48 : vector<8x128xf32>
    %50 = arith.addf %49, %11 : vector<8x128xf32>
    %51 = arith.negf %46 : vector<8x128xf32>
    %52 = math.exp %51 : vector<8x128xf32>
    %cst_31 = arith.constant 1.000000e+00 : f32
    %53 = vector.broadcast %cst_31 : f32 to vector<8x128xf32>
    %54 = arith.addf %53, %52 : vector<8x128xf32>
    %55 = arith.divf %53, %54 : vector<8x128xf32>
    %56 = vector.extract_strided_slice %55 {offsets = [0, 0], sizes = [8, 32], strides = [1, 1]} : vector<8x128xf32> to vector<8x32xf32>
    %57 = vector.extract_strided_slice %55 {offsets = [0, 32], sizes = [8, 32], strides = [1, 1]} : vector<8x128xf32> to vector<8x32xf32>
    %58 = vector.extract_strided_slice %55 {offsets = [0, 64], sizes = [8, 32], strides = [1, 1]} : vector<8x128xf32> to vector<8x32xf32>
    %cst_32 = arith.constant 2.000000e+00 : f32
    %59 = vector.broadcast %cst_32 : f32 to vector<8x32xf32>
    %60 = arith.mulf %59, %58 : vector<8x32xf32>
    %cst_33 = arith.constant 1.000000e+00 : f32
    %61 = vector.broadcast %cst_33 : f32 to vector<8x32xf32>
    %62 = arith.subf %60, %61 : vector<8x32xf32>
    %63 = vector.extract_strided_slice %55 {offsets = [0, 96], sizes = [8, 32], strides = [1, 1]} : vector<8x128xf32> to vector<8x32xf32>
    %64 = arith.mulf %57, %40 : vector<8x32xf32>
    %65 = arith.mulf %56, %62 : vector<8x32xf32>
    %66 = arith.addf %64, %65 : vector<8x32xf32>
    %67 = math.tanh %66 : vector<8x32xf32>
    %68 = arith.mulf %63, %67 : vector<8x32xf32>
    %69 = arith.negf %50 : vector<8x128xf32>
    %70 = math.exp %69 : vector<8x128xf32>
    %cst_34 = arith.constant 1.000000e+00 : f32
    %71 = vector.broadcast %cst_34 : f32 to vector<8x128xf32>
    %72 = arith.addf %71, %70 : vector<8x128xf32>
    %73 = arith.divf %71, %72 : vector<8x128xf32>
    %74 = vector.extract_strided_slice %73 {offsets = [0, 0], sizes = [8, 32], strides = [1, 1]} : vector<8x128xf32> to vector<8x32xf32>
    %75 = vector.extract_strided_slice %73 {offsets = [0, 32], sizes = [8, 32], strides = [1, 1]} : vector<8x128xf32> to vector<8x32xf32>
    %76 = vector.extract_strided_slice %73 {offsets = [0, 64], sizes = [8, 32], strides = [1, 1]} : vector<8x128xf32> to vector<8x32xf32>
    %cst_35 = arith.constant 2.000000e+00 : f32
    %77 = vector.broadcast %cst_35 : f32 to vector<8x32xf32>
    %78 = arith.mulf %77, %76 : vector<8x32xf32>
    %cst_36 = arith.constant 1.000000e+00 : f32
    %79 = vector.broadcast %cst_36 : f32 to vector<8x32xf32>
    %80 = arith.subf %78, %79 : vector<8x32xf32>
    %81 = vector.extract_strided_slice %73 {offsets = [0, 96], sizes = [8, 32], strides = [1, 1]} : vector<8x128xf32> to vector<8x32xf32>
    %82 = arith.mulf %75, %19 : vector<8x32xf32>
    %83 = arith.mulf %74, %80 : vector<8x32xf32>
    %84 = arith.addf %82, %83 : vector<8x32xf32>
    %85 = math.tanh %84 : vector<8x32xf32>
    %86 = arith.mulf %81, %85 : vector<8x32xf32>
    %87 = arith.truncf %68 : vector<8x32xf32> to vector<8x32xbf16>
    %88 = arith.truncf %86 : vector<8x32xf32> to vector<8x32xbf16>
    %89 = vector.extract_strided_slice %5 {offsets = [16, 0], sizes = [8, 128], strides = [1, 1]} : vector<64x128xf32> to vector<8x128xf32>
    %cst_37 = arith.constant dense<0.000000e+00> : vector<8x128xf32>
    %90 = tpu.matmul %87, %6, %cst_37 {dimension_numbers = #tpu.dot_dimension_numbers<[1], [0], [0], [1], [0, 0, 1, 1], [], []>} : vector<8x32xbf16>, vector<32x128xbf16>, vector<8x128xf32> -> vector<8x128xf32>
    %91 = arith.addf %89, %90 : vector<8x128xf32>
    %cst_38 = arith.constant dense<0.000000e+00> : vector<8x128xf32>
    %92 = tpu.matmul %87, %7, %cst_38 {dimension_numbers = #tpu.dot_dimension_numbers<[1], [0], [0], [1], [0, 0, 1, 1], [], []>} : vector<8x32xbf16>, vector<32x128xbf16>, vector<8x128xf32> -> vector<8x128xf32>
    %cst_39 = arith.constant dense<0.000000e+00> : vector<8x128xf32>
    %93 = tpu.matmul %88, %8, %cst_39 {dimension_numbers = #tpu.dot_dimension_numbers<[1], [0], [0], [1], [0, 0, 1, 1], [], []>} : vector<8x32xbf16>, vector<32x128xbf16>, vector<8x128xf32> -> vector<8x128xf32>
    %94 = arith.addf %92, %93 : vector<8x128xf32>
    %95 = arith.addf %94, %11 : vector<8x128xf32>
    %96 = arith.negf %91 : vector<8x128xf32>
    %97 = math.exp %96 : vector<8x128xf32>
    %cst_40 = arith.constant 1.000000e+00 : f32
    %98 = vector.broadcast %cst_40 : f32 to vector<8x128xf32>
    %99 = arith.addf %98, %97 : vector<8x128xf32>
    %100 = arith.divf %98, %99 : vector<8x128xf32>
    %101 = vector.extract_strided_slice %100 {offsets = [0, 0], sizes = [8, 32], strides = [1, 1]} : vector<8x128xf32> to vector<8x32xf32>
    %102 = vector.extract_strided_slice %100 {offsets = [0, 32], sizes = [8, 32], strides = [1, 1]} : vector<8x128xf32> to vector<8x32xf32>
    %103 = vector.extract_strided_slice %100 {offsets = [0, 64], sizes = [8, 32], strides = [1, 1]} : vector<8x128xf32> to vector<8x32xf32>
    %cst_41 = arith.constant 2.000000e+00 : f32
    %104 = vector.broadcast %cst_41 : f32 to vector<8x32xf32>
    %105 = arith.mulf %104, %103 : vector<8x32xf32>
    %cst_42 = arith.constant 1.000000e+00 : f32
    %106 = vector.broadcast %cst_42 : f32 to vector<8x32xf32>
    %107 = arith.subf %105, %106 : vector<8x32xf32>
    %108 = vector.extract_strided_slice %100 {offsets = [0, 96], sizes = [8, 32], strides = [1, 1]} : vector<8x128xf32> to vector<8x32xf32>
    %109 = arith.mulf %102, %66 : vector<8x32xf32>
    %110 = arith.mulf %101, %107 : vector<8x32xf32>
    %111 = arith.addf %109, %110 : vector<8x32xf32>
    %112 = math.tanh %111 : vector<8x32xf32>
    %113 = arith.mulf %108, %112 : vector<8x32xf32>
    %114 = arith.negf %95 : vector<8x128xf32>
    %115 = math.exp %114 : vector<8x128xf32>
    %cst_43 = arith.constant 1.000000e+00 : f32
    %116 = vector.broadcast %cst_43 : f32 to vector<8x128xf32>
    %117 = arith.addf %116, %115 : vector<8x128xf32>
    %118 = arith.divf %116, %117 : vector<8x128xf32>
    %119 = vector.extract_strided_slice %118 {offsets = [0, 0], sizes = [8, 32], strides = [1, 1]} : vector<8x128xf32> to vector<8x32xf32>
    %120 = vector.extract_strided_slice %118 {offsets = [0, 32], sizes = [8, 32], strides = [1, 1]} : vector<8x128xf32> to vector<8x32xf32>
    %121 = vector.extract_strided_slice %118 {offsets = [0, 64], sizes = [8, 32], strides = [1, 1]} : vector<8x128xf32> to vector<8x32xf32>
    %cst_44 = arith.constant 2.000000e+00 : f32
    %122 = vector.broadcast %cst_44 : f32 to vector<8x32xf32>
    %123 = arith.mulf %122, %121 : vector<8x32xf32>
    %cst_45 = arith.constant 1.000000e+00 : f32
    %124 = vector.broadcast %cst_45 : f32 to vector<8x32xf32>
    %125 = arith.subf %123, %124 : vector<8x32xf32>
    %126 = vector.extract_strided_slice %118 {offsets = [0, 96], sizes = [8, 32], strides = [1, 1]} : vector<8x128xf32> to vector<8x32xf32>
    %127 = arith.mulf %120, %84 : vector<8x32xf32>
    %128 = arith.mulf %119, %125 : vector<8x32xf32>
    %129 = arith.addf %127, %128 : vector<8x32xf32>
    %130 = math.tanh %129 : vector<8x32xf32>
    %131 = arith.mulf %126, %130 : vector<8x32xf32>
    %132 = arith.truncf %113 : vector<8x32xf32> to vector<8x32xbf16>
    %133 = arith.truncf %131 : vector<8x32xf32> to vector<8x32xbf16>
    %134 = vector.extract_strided_slice %5 {offsets = [24, 0], sizes = [8, 128], strides = [1, 1]} : vector<64x128xf32> to vector<8x128xf32>
    %cst_46 = arith.constant dense<0.000000e+00> : vector<8x128xf32>
    %135 = tpu.matmul %132, %6, %cst_46 {dimension_numbers = #tpu.dot_dimension_numbers<[1], [0], [0], [1], [0, 0, 1, 1], [], []>} : vector<8x32xbf16>, vector<32x128xbf16>, vector<8x128xf32> -> vector<8x128xf32>
    %136 = arith.addf %134, %135 : vector<8x128xf32>
    %cst_47 = arith.constant dense<0.000000e+00> : vector<8x128xf32>
    %137 = tpu.matmul %132, %7, %cst_47 {dimension_numbers = #tpu.dot_dimension_numbers<[1], [0], [0], [1], [0, 0, 1, 1], [], []>} : vector<8x32xbf16>, vector<32x128xbf16>, vector<8x128xf32> -> vector<8x128xf32>
    %cst_48 = arith.constant dense<0.000000e+00> : vector<8x128xf32>
    %138 = tpu.matmul %133, %8, %cst_48 {dimension_numbers = #tpu.dot_dimension_numbers<[1], [0], [0], [1], [0, 0, 1, 1], [], []>} : vector<8x32xbf16>, vector<32x128xbf16>, vector<8x128xf32> -> vector<8x128xf32>
    %139 = arith.addf %137, %138 : vector<8x128xf32>
    %140 = arith.addf %139, %11 : vector<8x128xf32>
    %141 = arith.negf %136 : vector<8x128xf32>
    %142 = math.exp %141 : vector<8x128xf32>
    %cst_49 = arith.constant 1.000000e+00 : f32
    %143 = vector.broadcast %cst_49 : f32 to vector<8x128xf32>
    %144 = arith.addf %143, %142 : vector<8x128xf32>
    %145 = arith.divf %143, %144 : vector<8x128xf32>
    %146 = vector.extract_strided_slice %145 {offsets = [0, 0], sizes = [8, 32], strides = [1, 1]} : vector<8x128xf32> to vector<8x32xf32>
    %147 = vector.extract_strided_slice %145 {offsets = [0, 32], sizes = [8, 32], strides = [1, 1]} : vector<8x128xf32> to vector<8x32xf32>
    %148 = vector.extract_strided_slice %145 {offsets = [0, 64], sizes = [8, 32], strides = [1, 1]} : vector<8x128xf32> to vector<8x32xf32>
    %cst_50 = arith.constant 2.000000e+00 : f32
    %149 = vector.broadcast %cst_50 : f32 to vector<8x32xf32>
    %150 = arith.mulf %149, %148 : vector<8x32xf32>
    %cst_51 = arith.constant 1.000000e+00 : f32
    %151 = vector.broadcast %cst_51 : f32 to vector<8x32xf32>
    %152 = arith.subf %150, %151 : vector<8x32xf32>
    %153 = vector.extract_strided_slice %145 {offsets = [0, 96], sizes = [8, 32], strides = [1, 1]} : vector<8x128xf32> to vector<8x32xf32>
    %154 = arith.mulf %147, %111 : vector<8x32xf32>
    %155 = arith.mulf %146, %152 : vector<8x32xf32>
    %156 = arith.addf %154, %155 : vector<8x32xf32>
    %157 = math.tanh %156 : vector<8x32xf32>
    %158 = arith.mulf %153, %157 : vector<8x32xf32>
    %159 = arith.negf %140 : vector<8x128xf32>
    %160 = math.exp %159 : vector<8x128xf32>
    %cst_52 = arith.constant 1.000000e+00 : f32
    %161 = vector.broadcast %cst_52 : f32 to vector<8x128xf32>
    %162 = arith.addf %161, %160 : vector<8x128xf32>
    %163 = arith.divf %161, %162 : vector<8x128xf32>
    %164 = vector.extract_strided_slice %163 {offsets = [0, 0], sizes = [8, 32], strides = [1, 1]} : vector<8x128xf32> to vector<8x32xf32>
    %165 = vector.extract_strided_slice %163 {offsets = [0, 32], sizes = [8, 32], strides = [1, 1]} : vector<8x128xf32> to vector<8x32xf32>
    %166 = vector.extract_strided_slice %163 {offsets = [0, 64], sizes = [8, 32], strides = [1, 1]} : vector<8x128xf32> to vector<8x32xf32>
    %cst_53 = arith.constant 2.000000e+00 : f32
    %167 = vector.broadcast %cst_53 : f32 to vector<8x32xf32>
    %168 = arith.mulf %167, %166 : vector<8x32xf32>
    %cst_54 = arith.constant 1.000000e+00 : f32
    %169 = vector.broadcast %cst_54 : f32 to vector<8x32xf32>
    %170 = arith.subf %168, %169 : vector<8x32xf32>
    %171 = vector.extract_strided_slice %163 {offsets = [0, 96], sizes = [8, 32], strides = [1, 1]} : vector<8x128xf32> to vector<8x32xf32>
    %172 = arith.mulf %165, %129 : vector<8x32xf32>
    %173 = arith.mulf %164, %170 : vector<8x32xf32>
    %174 = arith.addf %172, %173 : vector<8x32xf32>
    %175 = math.tanh %174 : vector<8x32xf32>
    %176 = arith.mulf %171, %175 : vector<8x32xf32>
    %177 = arith.truncf %158 : vector<8x32xf32> to vector<8x32xbf16>
    %178 = arith.truncf %176 : vector<8x32xf32> to vector<8x32xbf16>
    %179 = vector.extract_strided_slice %5 {offsets = [32, 0], sizes = [8, 128], strides = [1, 1]} : vector<64x128xf32> to vector<8x128xf32>
    %cst_55 = arith.constant dense<0.000000e+00> : vector<8x128xf32>
    %180 = tpu.matmul %177, %6, %cst_55 {dimension_numbers = #tpu.dot_dimension_numbers<[1], [0], [0], [1], [0, 0, 1, 1], [], []>} : vector<8x32xbf16>, vector<32x128xbf16>, vector<8x128xf32> -> vector<8x128xf32>
    %181 = arith.addf %179, %180 : vector<8x128xf32>
    %cst_56 = arith.constant dense<0.000000e+00> : vector<8x128xf32>
    %182 = tpu.matmul %177, %7, %cst_56 {dimension_numbers = #tpu.dot_dimension_numbers<[1], [0], [0], [1], [0, 0, 1, 1], [], []>} : vector<8x32xbf16>, vector<32x128xbf16>, vector<8x128xf32> -> vector<8x128xf32>
    %cst_57 = arith.constant dense<0.000000e+00> : vector<8x128xf32>
    %183 = tpu.matmul %178, %8, %cst_57 {dimension_numbers = #tpu.dot_dimension_numbers<[1], [0], [0], [1], [0, 0, 1, 1], [], []>} : vector<8x32xbf16>, vector<32x128xbf16>, vector<8x128xf32> -> vector<8x128xf32>
    %184 = arith.addf %182, %183 : vector<8x128xf32>
    %185 = arith.addf %184, %11 : vector<8x128xf32>
    %186 = arith.negf %181 : vector<8x128xf32>
    %187 = math.exp %186 : vector<8x128xf32>
    %cst_58 = arith.constant 1.000000e+00 : f32
    %188 = vector.broadcast %cst_58 : f32 to vector<8x128xf32>
    %189 = arith.addf %188, %187 : vector<8x128xf32>
    %190 = arith.divf %188, %189 : vector<8x128xf32>
    %191 = vector.extract_strided_slice %190 {offsets = [0, 0], sizes = [8, 32], strides = [1, 1]} : vector<8x128xf32> to vector<8x32xf32>
    %192 = vector.extract_strided_slice %190 {offsets = [0, 32], sizes = [8, 32], strides = [1, 1]} : vector<8x128xf32> to vector<8x32xf32>
    %193 = vector.extract_strided_slice %190 {offsets = [0, 64], sizes = [8, 32], strides = [1, 1]} : vector<8x128xf32> to vector<8x32xf32>
    %cst_59 = arith.constant 2.000000e+00 : f32
    %194 = vector.broadcast %cst_59 : f32 to vector<8x32xf32>
    %195 = arith.mulf %194, %193 : vector<8x32xf32>
    %cst_60 = arith.constant 1.000000e+00 : f32
    %196 = vector.broadcast %cst_60 : f32 to vector<8x32xf32>
    %197 = arith.subf %195, %196 : vector<8x32xf32>
    %198 = vector.extract_strided_slice %190 {offsets = [0, 96], sizes = [8, 32], strides = [1, 1]} : vector<8x128xf32> to vector<8x32xf32>
    %199 = arith.mulf %192, %156 : vector<8x32xf32>
    %200 = arith.mulf %191, %197 : vector<8x32xf32>
    %201 = arith.addf %199, %200 : vector<8x32xf32>
    %202 = math.tanh %201 : vector<8x32xf32>
    %203 = arith.mulf %198, %202 : vector<8x32xf32>
    %204 = arith.negf %185 : vector<8x128xf32>
    %205 = math.exp %204 : vector<8x128xf32>
    %cst_61 = arith.constant 1.000000e+00 : f32
    %206 = vector.broadcast %cst_61 : f32 to vector<8x128xf32>
    %207 = arith.addf %206, %205 : vector<8x128xf32>
    %208 = arith.divf %206, %207 : vector<8x128xf32>
    %209 = vector.extract_strided_slice %208 {offsets = [0, 0], sizes = [8, 32], strides = [1, 1]} : vector<8x128xf32> to vector<8x32xf32>
    %210 = vector.extract_strided_slice %208 {offsets = [0, 32], sizes = [8, 32], strides = [1, 1]} : vector<8x128xf32> to vector<8x32xf32>
    %211 = vector.extract_strided_slice %208 {offsets = [0, 64], sizes = [8, 32], strides = [1, 1]} : vector<8x128xf32> to vector<8x32xf32>
    %cst_62 = arith.constant 2.000000e+00 : f32
    %212 = vector.broadcast %cst_62 : f32 to vector<8x32xf32>
    %213 = arith.mulf %212, %211 : vector<8x32xf32>
    %cst_63 = arith.constant 1.000000e+00 : f32
    %214 = vector.broadcast %cst_63 : f32 to vector<8x32xf32>
    %215 = arith.subf %213, %214 : vector<8x32xf32>
    %216 = vector.extract_strided_slice %208 {offsets = [0, 96], sizes = [8, 32], strides = [1, 1]} : vector<8x128xf32> to vector<8x32xf32>
    %217 = arith.mulf %210, %174 : vector<8x32xf32>
    %218 = arith.mulf %209, %215 : vector<8x32xf32>
    %219 = arith.addf %217, %218 : vector<8x32xf32>
    %220 = math.tanh %219 : vector<8x32xf32>
    %221 = arith.mulf %216, %220 : vector<8x32xf32>
    %222 = arith.truncf %203 : vector<8x32xf32> to vector<8x32xbf16>
    %223 = arith.truncf %221 : vector<8x32xf32> to vector<8x32xbf16>
    %224 = vector.extract_strided_slice %5 {offsets = [40, 0], sizes = [8, 128], strides = [1, 1]} : vector<64x128xf32> to vector<8x128xf32>
    %cst_64 = arith.constant dense<0.000000e+00> : vector<8x128xf32>
    %225 = tpu.matmul %222, %6, %cst_64 {dimension_numbers = #tpu.dot_dimension_numbers<[1], [0], [0], [1], [0, 0, 1, 1], [], []>} : vector<8x32xbf16>, vector<32x128xbf16>, vector<8x128xf32> -> vector<8x128xf32>
    %226 = arith.addf %224, %225 : vector<8x128xf32>
    %cst_65 = arith.constant dense<0.000000e+00> : vector<8x128xf32>
    %227 = tpu.matmul %222, %7, %cst_65 {dimension_numbers = #tpu.dot_dimension_numbers<[1], [0], [0], [1], [0, 0, 1, 1], [], []>} : vector<8x32xbf16>, vector<32x128xbf16>, vector<8x128xf32> -> vector<8x128xf32>
    %cst_66 = arith.constant dense<0.000000e+00> : vector<8x128xf32>
    %228 = tpu.matmul %223, %8, %cst_66 {dimension_numbers = #tpu.dot_dimension_numbers<[1], [0], [0], [1], [0, 0, 1, 1], [], []>} : vector<8x32xbf16>, vector<32x128xbf16>, vector<8x128xf32> -> vector<8x128xf32>
    %229 = arith.addf %227, %228 : vector<8x128xf32>
    %230 = arith.addf %229, %11 : vector<8x128xf32>
    %231 = arith.negf %226 : vector<8x128xf32>
    %232 = math.exp %231 : vector<8x128xf32>
    %cst_67 = arith.constant 1.000000e+00 : f32
    %233 = vector.broadcast %cst_67 : f32 to vector<8x128xf32>
    %234 = arith.addf %233, %232 : vector<8x128xf32>
    %235 = arith.divf %233, %234 : vector<8x128xf32>
    %236 = vector.extract_strided_slice %235 {offsets = [0, 0], sizes = [8, 32], strides = [1, 1]} : vector<8x128xf32> to vector<8x32xf32>
    %237 = vector.extract_strided_slice %235 {offsets = [0, 32], sizes = [8, 32], strides = [1, 1]} : vector<8x128xf32> to vector<8x32xf32>
    %238 = vector.extract_strided_slice %235 {offsets = [0, 64], sizes = [8, 32], strides = [1, 1]} : vector<8x128xf32> to vector<8x32xf32>
    %cst_68 = arith.constant 2.000000e+00 : f32
    %239 = vector.broadcast %cst_68 : f32 to vector<8x32xf32>
    %240 = arith.mulf %239, %238 : vector<8x32xf32>
    %cst_69 = arith.constant 1.000000e+00 : f32
    %241 = vector.broadcast %cst_69 : f32 to vector<8x32xf32>
    %242 = arith.subf %240, %241 : vector<8x32xf32>
    %243 = vector.extract_strided_slice %235 {offsets = [0, 96], sizes = [8, 32], strides = [1, 1]} : vector<8x128xf32> to vector<8x32xf32>
    %244 = arith.mulf %237, %201 : vector<8x32xf32>
    %245 = arith.mulf %236, %242 : vector<8x32xf32>
    %246 = arith.addf %244, %245 : vector<8x32xf32>
    %247 = math.tanh %246 : vector<8x32xf32>
    %248 = arith.mulf %243, %247 : vector<8x32xf32>
    %249 = arith.negf %230 : vector<8x128xf32>
    %250 = math.exp %249 : vector<8x128xf32>
    %cst_70 = arith.constant 1.000000e+00 : f32
    %251 = vector.broadcast %cst_70 : f32 to vector<8x128xf32>
    %252 = arith.addf %251, %250 : vector<8x128xf32>
    %253 = arith.divf %251, %252 : vector<8x128xf32>
    %254 = vector.extract_strided_slice %253 {offsets = [0, 0], sizes = [8, 32], strides = [1, 1]} : vector<8x128xf32> to vector<8x32xf32>
    %255 = vector.extract_strided_slice %253 {offsets = [0, 32], sizes = [8, 32], strides = [1, 1]} : vector<8x128xf32> to vector<8x32xf32>
    %256 = vector.extract_strided_slice %253 {offsets = [0, 64], sizes = [8, 32], strides = [1, 1]} : vector<8x128xf32> to vector<8x32xf32>
    %cst_71 = arith.constant 2.000000e+00 : f32
    %257 = vector.broadcast %cst_71 : f32 to vector<8x32xf32>
    %258 = arith.mulf %257, %256 : vector<8x32xf32>
    %cst_72 = arith.constant 1.000000e+00 : f32
    %259 = vector.broadcast %cst_72 : f32 to vector<8x32xf32>
    %260 = arith.subf %258, %259 : vector<8x32xf32>
    %261 = vector.extract_strided_slice %253 {offsets = [0, 96], sizes = [8, 32], strides = [1, 1]} : vector<8x128xf32> to vector<8x32xf32>
    %262 = arith.mulf %255, %219 : vector<8x32xf32>
    %263 = arith.mulf %254, %260 : vector<8x32xf32>
    %264 = arith.addf %262, %263 : vector<8x32xf32>
    %265 = math.tanh %264 : vector<8x32xf32>
    %266 = arith.mulf %261, %265 : vector<8x32xf32>
    %267 = arith.truncf %248 : vector<8x32xf32> to vector<8x32xbf16>
    %268 = arith.truncf %266 : vector<8x32xf32> to vector<8x32xbf16>
    %269 = vector.extract_strided_slice %5 {offsets = [48, 0], sizes = [8, 128], strides = [1, 1]} : vector<64x128xf32> to vector<8x128xf32>
    %cst_73 = arith.constant dense<0.000000e+00> : vector<8x128xf32>
    %270 = tpu.matmul %267, %6, %cst_73 {dimension_numbers = #tpu.dot_dimension_numbers<[1], [0], [0], [1], [0, 0, 1, 1], [], []>} : vector<8x32xbf16>, vector<32x128xbf16>, vector<8x128xf32> -> vector<8x128xf32>
    %271 = arith.addf %269, %270 : vector<8x128xf32>
    %cst_74 = arith.constant dense<0.000000e+00> : vector<8x128xf32>
    %272 = tpu.matmul %267, %7, %cst_74 {dimension_numbers = #tpu.dot_dimension_numbers<[1], [0], [0], [1], [0, 0, 1, 1], [], []>} : vector<8x32xbf16>, vector<32x128xbf16>, vector<8x128xf32> -> vector<8x128xf32>
    %cst_75 = arith.constant dense<0.000000e+00> : vector<8x128xf32>
    %273 = tpu.matmul %268, %8, %cst_75 {dimension_numbers = #tpu.dot_dimension_numbers<[1], [0], [0], [1], [0, 0, 1, 1], [], []>} : vector<8x32xbf16>, vector<32x128xbf16>, vector<8x128xf32> -> vector<8x128xf32>
    %274 = arith.addf %272, %273 : vector<8x128xf32>
    %275 = arith.addf %274, %11 : vector<8x128xf32>
    %276 = arith.negf %271 : vector<8x128xf32>
    %277 = math.exp %276 : vector<8x128xf32>
    %cst_76 = arith.constant 1.000000e+00 : f32
    %278 = vector.broadcast %cst_76 : f32 to vector<8x128xf32>
    %279 = arith.addf %278, %277 : vector<8x128xf32>
    %280 = arith.divf %278, %279 : vector<8x128xf32>
    %281 = vector.extract_strided_slice %280 {offsets = [0, 0], sizes = [8, 32], strides = [1, 1]} : vector<8x128xf32> to vector<8x32xf32>
    %282 = vector.extract_strided_slice %280 {offsets = [0, 32], sizes = [8, 32], strides = [1, 1]} : vector<8x128xf32> to vector<8x32xf32>
    %283 = vector.extract_strided_slice %280 {offsets = [0, 64], sizes = [8, 32], strides = [1, 1]} : vector<8x128xf32> to vector<8x32xf32>
    %cst_77 = arith.constant 2.000000e+00 : f32
    %284 = vector.broadcast %cst_77 : f32 to vector<8x32xf32>
    %285 = arith.mulf %284, %283 : vector<8x32xf32>
    %cst_78 = arith.constant 1.000000e+00 : f32
    %286 = vector.broadcast %cst_78 : f32 to vector<8x32xf32>
    %287 = arith.subf %285, %286 : vector<8x32xf32>
    %288 = vector.extract_strided_slice %280 {offsets = [0, 96], sizes = [8, 32], strides = [1, 1]} : vector<8x128xf32> to vector<8x32xf32>
    %289 = arith.mulf %282, %246 : vector<8x32xf32>
    %290 = arith.mulf %281, %287 : vector<8x32xf32>
    %291 = arith.addf %289, %290 : vector<8x32xf32>
    %292 = math.tanh %291 : vector<8x32xf32>
    %293 = arith.mulf %288, %292 : vector<8x32xf32>
    %294 = arith.negf %275 : vector<8x128xf32>
    %295 = math.exp %294 : vector<8x128xf32>
    %cst_79 = arith.constant 1.000000e+00 : f32
    %296 = vector.broadcast %cst_79 : f32 to vector<8x128xf32>
    %297 = arith.addf %296, %295 : vector<8x128xf32>
    %298 = arith.divf %296, %297 : vector<8x128xf32>
    %299 = vector.extract_strided_slice %298 {offsets = [0, 0], sizes = [8, 32], strides = [1, 1]} : vector<8x128xf32> to vector<8x32xf32>
    %300 = vector.extract_strided_slice %298 {offsets = [0, 32], sizes = [8, 32], strides = [1, 1]} : vector<8x128xf32> to vector<8x32xf32>
    %301 = vector.extract_strided_slice %298 {offsets = [0, 64], sizes = [8, 32], strides = [1, 1]} : vector<8x128xf32> to vector<8x32xf32>
    %cst_80 = arith.constant 2.000000e+00 : f32
    %302 = vector.broadcast %cst_80 : f32 to vector<8x32xf32>
    %303 = arith.mulf %302, %301 : vector<8x32xf32>
    %cst_81 = arith.constant 1.000000e+00 : f32
    %304 = vector.broadcast %cst_81 : f32 to vector<8x32xf32>
    %305 = arith.subf %303, %304 : vector<8x32xf32>
    %306 = vector.extract_strided_slice %298 {offsets = [0, 96], sizes = [8, 32], strides = [1, 1]} : vector<8x128xf32> to vector<8x32xf32>
    %307 = arith.mulf %300, %264 : vector<8x32xf32>
    %308 = arith.mulf %299, %305 : vector<8x32xf32>
    %309 = arith.addf %307, %308 : vector<8x32xf32>
    %310 = math.tanh %309 : vector<8x32xf32>
    %311 = arith.mulf %306, %310 : vector<8x32xf32>
    %312 = arith.truncf %293 : vector<8x32xf32> to vector<8x32xbf16>
    %313 = arith.truncf %311 : vector<8x32xf32> to vector<8x32xbf16>
    %314 = vector.extract_strided_slice %5 {offsets = [56, 0], sizes = [8, 128], strides = [1, 1]} : vector<64x128xf32> to vector<8x128xf32>
    %cst_82 = arith.constant dense<0.000000e+00> : vector<8x128xf32>
    %315 = tpu.matmul %312, %6, %cst_82 {dimension_numbers = #tpu.dot_dimension_numbers<[1], [0], [0], [1], [0, 0, 1, 1], [], []>} : vector<8x32xbf16>, vector<32x128xbf16>, vector<8x128xf32> -> vector<8x128xf32>
    %316 = arith.addf %314, %315 : vector<8x128xf32>
    %cst_83 = arith.constant dense<0.000000e+00> : vector<8x128xf32>
    %317 = tpu.matmul %312, %7, %cst_83 {dimension_numbers = #tpu.dot_dimension_numbers<[1], [0], [0], [1], [0, 0, 1, 1], [], []>} : vector<8x32xbf16>, vector<32x128xbf16>, vector<8x128xf32> -> vector<8x128xf32>
    %cst_84 = arith.constant dense<0.000000e+00> : vector<8x128xf32>
    %318 = tpu.matmul %313, %8, %cst_84 {dimension_numbers = #tpu.dot_dimension_numbers<[1], [0], [0], [1], [0, 0, 1, 1], [], []>} : vector<8x32xbf16>, vector<32x128xbf16>, vector<8x128xf32> -> vector<8x128xf32>
    %319 = arith.addf %317, %318 : vector<8x128xf32>
    %320 = arith.addf %319, %11 : vector<8x128xf32>
    %321 = arith.negf %316 : vector<8x128xf32>
    %322 = math.exp %321 : vector<8x128xf32>
    %cst_85 = arith.constant 1.000000e+00 : f32
    %323 = vector.broadcast %cst_85 : f32 to vector<8x128xf32>
    %324 = arith.addf %323, %322 : vector<8x128xf32>
    %325 = arith.divf %323, %324 : vector<8x128xf32>
    %326 = vector.extract_strided_slice %325 {offsets = [0, 0], sizes = [8, 32], strides = [1, 1]} : vector<8x128xf32> to vector<8x32xf32>
    %327 = vector.extract_strided_slice %325 {offsets = [0, 32], sizes = [8, 32], strides = [1, 1]} : vector<8x128xf32> to vector<8x32xf32>
    %328 = vector.extract_strided_slice %325 {offsets = [0, 64], sizes = [8, 32], strides = [1, 1]} : vector<8x128xf32> to vector<8x32xf32>
    %cst_86 = arith.constant 2.000000e+00 : f32
    %329 = vector.broadcast %cst_86 : f32 to vector<8x32xf32>
    %330 = arith.mulf %329, %328 : vector<8x32xf32>
    %cst_87 = arith.constant 1.000000e+00 : f32
    %331 = vector.broadcast %cst_87 : f32 to vector<8x32xf32>
    %332 = arith.subf %330, %331 : vector<8x32xf32>
    %333 = vector.extract_strided_slice %325 {offsets = [0, 96], sizes = [8, 32], strides = [1, 1]} : vector<8x128xf32> to vector<8x32xf32>
    %334 = arith.mulf %327, %291 : vector<8x32xf32>
    %335 = arith.mulf %326, %332 : vector<8x32xf32>
    %336 = arith.addf %334, %335 : vector<8x32xf32>
    %337 = math.tanh %336 : vector<8x32xf32>
    %338 = arith.mulf %333, %337 : vector<8x32xf32>
    %339 = arith.negf %320 : vector<8x128xf32>
    %340 = math.exp %339 : vector<8x128xf32>
    %cst_88 = arith.constant 1.000000e+00 : f32
    %341 = vector.broadcast %cst_88 : f32 to vector<8x128xf32>
    %342 = arith.addf %341, %340 : vector<8x128xf32>
    %343 = arith.divf %341, %342 : vector<8x128xf32>
    %344 = vector.extract_strided_slice %343 {offsets = [0, 0], sizes = [8, 32], strides = [1, 1]} : vector<8x128xf32> to vector<8x32xf32>
    %345 = vector.extract_strided_slice %343 {offsets = [0, 32], sizes = [8, 32], strides = [1, 1]} : vector<8x128xf32> to vector<8x32xf32>
    %346 = vector.extract_strided_slice %343 {offsets = [0, 64], sizes = [8, 32], strides = [1, 1]} : vector<8x128xf32> to vector<8x32xf32>
    %cst_89 = arith.constant 2.000000e+00 : f32
    %347 = vector.broadcast %cst_89 : f32 to vector<8x32xf32>
    %348 = arith.mulf %347, %346 : vector<8x32xf32>
    %cst_90 = arith.constant 1.000000e+00 : f32
    %349 = vector.broadcast %cst_90 : f32 to vector<8x32xf32>
    %350 = arith.subf %348, %349 : vector<8x32xf32>
    %351 = vector.extract_strided_slice %343 {offsets = [0, 96], sizes = [8, 32], strides = [1, 1]} : vector<8x128xf32> to vector<8x32xf32>
    %352 = arith.mulf %345, %309 : vector<8x32xf32>
    %353 = arith.mulf %344, %350 : vector<8x32xf32>
    %354 = arith.addf %352, %353 : vector<8x32xf32>
    %355 = math.tanh %354 : vector<8x32xf32>
    %356 = arith.mulf %351, %355 : vector<8x32xf32>
    %357 = arith.truncf %338 : vector<8x32xf32> to vector<8x32xbf16>
    %358 = arith.truncf %356 : vector<8x32xf32> to vector<8x32xbf16>
    %cst_91 = arith.constant dense<0.000000e+00> : vector<8x128xf32>
    %359 = tpu.matmul %357, %7, %cst_91 {dimension_numbers = #tpu.dot_dimension_numbers<[1], [0], [0], [1], [0, 0, 1, 1], [], []>} : vector<8x32xbf16>, vector<32x128xbf16>, vector<8x128xf32> -> vector<8x128xf32>
    %cst_92 = arith.constant dense<0.000000e+00> : vector<8x128xf32>
    %360 = tpu.matmul %358, %8, %cst_92 {dimension_numbers = #tpu.dot_dimension_numbers<[1], [0], [0], [1], [0, 0, 1, 1], [], []>} : vector<8x32xbf16>, vector<32x128xbf16>, vector<8x128xf32> -> vector<8x128xf32>
    %361 = arith.addf %359, %360 : vector<8x128xf32>
    %362 = arith.addf %361, %11 : vector<8x128xf32>
    %363 = arith.negf %362 : vector<8x128xf32>
    %364 = math.exp %363 : vector<8x128xf32>
    %cst_93 = arith.constant 1.000000e+00 : f32
    %365 = vector.broadcast %cst_93 : f32 to vector<8x128xf32>
    %366 = arith.addf %365, %364 : vector<8x128xf32>
    %367 = arith.divf %365, %366 : vector<8x128xf32>
    %368 = vector.extract_strided_slice %367 {offsets = [0, 0], sizes = [8, 32], strides = [1, 1]} : vector<8x128xf32> to vector<8x32xf32>
    %369 = vector.extract_strided_slice %367 {offsets = [0, 32], sizes = [8, 32], strides = [1, 1]} : vector<8x128xf32> to vector<8x32xf32>
    %370 = vector.extract_strided_slice %367 {offsets = [0, 64], sizes = [8, 32], strides = [1, 1]} : vector<8x128xf32> to vector<8x32xf32>
    %cst_94 = arith.constant 2.000000e+00 : f32
    %371 = vector.broadcast %cst_94 : f32 to vector<8x32xf32>
    %372 = arith.mulf %371, %370 : vector<8x32xf32>
    %cst_95 = arith.constant 1.000000e+00 : f32
    %373 = vector.broadcast %cst_95 : f32 to vector<8x32xf32>
    %374 = arith.subf %372, %373 : vector<8x32xf32>
    %375 = vector.extract_strided_slice %367 {offsets = [0, 96], sizes = [8, 32], strides = [1, 1]} : vector<8x128xf32> to vector<8x32xf32>
    %376 = arith.mulf %369, %354 : vector<8x32xf32>
    %377 = arith.mulf %368, %374 : vector<8x32xf32>
    %378 = arith.addf %376, %377 : vector<8x32xf32>
    %379 = math.tanh %378 : vector<8x32xf32>
    %380 = arith.mulf %375, %379 : vector<8x32xf32>
    %381 = tpu.concatenate %86, %131, %176, %221, %266, %311, %356, %380 in 0 : vector<8x32xf32>, vector<8x32xf32>, vector<8x32xf32>, vector<8x32xf32>, vector<8x32xf32>, vector<8x32xf32>, vector<8x32xf32>, vector<8x32xf32> -> vector<64x32xf32>
    %382 = arith.truncf %381 : vector<64x32xf32> to vector<64x32xbf16>
    %c0_96 = arith.constant 0 : index
    %c0_97 = arith.constant 0 : index
    %383 = vector.load %arg7[%c0_96, %c0_97] : memref<32x64xbf16, #tpu.memory_space<vmem>>, vector<32x64xbf16>
    %cst_98 = arith.constant dense<0.000000e+00> : vector<64x64xf32>
    %384 = tpu.matmul %382, %383, %cst_98 {dimension_numbers = #tpu.dot_dimension_numbers<[1], [0], [0], [1], [0, 0, 1, 1], [], []>} : vector<64x32xbf16>, vector<32x64xbf16>, vector<64x64xf32> -> vector<64x64xf32>
    %c0_99 = arith.constant 0 : index
    %c0_100 = arith.constant 0 : index
    %385 = vector.load %arg8[%c0_99, %c0_100] : memref<1x64xf32, #tpu.memory_space<vmem>>, vector<1x64xf32>
    %386 = vector.broadcast %385 : vector<1x64xf32> to vector<64x64xf32>
    %387 = arith.addf %384, %386 : vector<64x64xf32>
    %c0_101 = arith.constant 0 : index
    %c0_102 = arith.constant 0 : index
    %388 = vector.load %arg11[%c0_101, %c0_102] : memref<64x64xf32, #tpu.memory_space<vmem>>, vector<64x64xf32>
    tpu.vector_store %arg11[%c0_101, %c0_102], %387 {strides = array<i32>} : memref<64x64xf32, #tpu.memory_space<vmem>>, vector<64x64xf32>,
    %c0_103 = arith.constant 0 : index
    %c0_104 = arith.constant 0 : index
    %389 = vector.load %arg12[%c0_103, %c0_104] : memref<8x128xf32, #tpu.memory_space<vmem>>, vector<8x32xf32>
    tpu.vector_store %arg12[%c0_103, %c0_104], %338 {strides = array<i32>} : memref<8x128xf32, #tpu.memory_space<vmem>>, vector<8x32xf32>,
    %c0_105 = arith.constant 0 : index
    %c32 = arith.constant 32 : index
    %390 = vector.load %arg12[%c0_105, %c32] : memref<8x128xf32, #tpu.memory_space<vmem>>, vector<8x32xf32>
    tpu.vector_store %arg12[%c0_105, %c32], %380 {strides = array<i32>} : memref<8x128xf32, #tpu.memory_space<vmem>>, vector<8x32xf32>,
    %c0_106 = arith.constant 0 : index
    %c64 = arith.constant 64 : index
    %391 = vector.load %arg12[%c0_106, %c64] : memref<8x128xf32, #tpu.memory_space<vmem>>, vector<8x32xf32>
    tpu.vector_store %arg12[%c0_106, %c64], %336 {strides = array<i32>} : memref<8x128xf32, #tpu.memory_space<vmem>>, vector<8x32xf32>,
    %c0_107 = arith.constant 0 : index
    %c96 = arith.constant 96 : index
    %392 = vector.load %arg12[%c0_107, %c96] : memref<8x128xf32, #tpu.memory_space<vmem>>, vector<8x32xf32>
    tpu.vector_store %arg12[%c0_107, %c96], %378 {strides = array<i32>} : memref<8x128xf32, #tpu.memory_space<vmem>>, vector<8x32xf32>,
    return
  }
}

</mosaic_0001>

<bundles_post_ra>
// kernel: mymodel_forward.1
= control target key start
LH: loop header
LB: loop body
LE: loop exit
PB: predicated region body
PF: predicated region fallthrough
CT: control target
= control target key end

     0   :  { %vm92_vm0 = vcmask 261120   ;;  %v2387_v7 = vmov 0.0   ;;  %vm2388_vm1 = vmmov 0   ;;  %s2390_s22 = smov 32   ;;  %vm1862_vm2 = vcmask 523520   ;;  %s2942_s1 = inlined_call_operand.vmem [shape: bf16[32,128], index: 1, kind: input, shape index: {}]   ;;  %s2943_s0 = inlined_call_operand.vmem [shape: bf16[64,32], index: 0, kind: input, shape index: {}]   ;;  %s2944_s2 = inlined_call_operand.vmem [shape: bf16[32,128], index: 2, kind: input, shape index: {}]   ;;  %s2945_s9 = inlined_call_operand.vmem [shape: f32[2,8,32], index: 9, kind: input, shape index: {}, may-alias: {9,10}]   ;;  %s2946_s3 = inlined_call_operand.vmem [shape: f32[1,128], index: 3, kind: input, shape index: {}]   ;;  %s2947_s10 = inlined_call_operand.vmem [shape: f32[2,8,32], index: 10, kind: input, shape index: {}, may-alias: {9,10}]   ;;  %s2948_s5 = inlined_call_operand.vmem [shape: bf16[32,128], index: 5, kind: input, shape index: {}]   ;;  %s2949_s4 = inlined_call_operand.vmem [shape: bf16[32,128], index: 4, kind: input, shape index: {}]   ;;  %s2950_s6 = inlined_call_operand.vmem [shape: f32[1,128], index: 6, kind: input, shape index: {}]   ;;  %s2951_s7 = inlined_call_operand.vmem [shape: bf16[32,64], index: 7, kind: input, shape index: {}]   ;;  %s2952_s12 = inlined_call_operand.vmem [shape: f32[8,128], index: 12, kind: output, shape index: {1}]   ;;  %s2953_s8 = inlined_call_operand.vmem [shape: f32[1,64], index: 8, kind: input, shape index: {}]   ;;  %s2954_s11 = inlined_call_operand.vmem [shape: f32[64,64], index: 11, kind: output, shape index: {0}]  }
   0x1   :  { %v2275_v0 = vld [vmem:[%s2942_s1] sm:$0xff]   ;;  %v2276_v1 = vld [vmem:[%s2942_s1 + $0x8] sm:$0xff]   ;;  %v2277_v2 = vld [vmem:[%s2943_s0 + $0x10] sm:$0xff]   ;;  %vm1868_vm3 = vcmask 785920   ;;  %vm1874_vm4 = vcmask 1048320   ;;  %vm1844_vm5 = vcmask 523264  }
   0x2   :  { %2267 = vmatprep.subr.bf16.mxu1 %v2275_v0  ;;  %2051 = vmatprep.subr.bf16.mxu0 %v2275_v0  ;;  %v2278_v3 = vld [vmem:[%s2943_s0 + $0x18] sm:$0xff]   ;;  %v2280_v4 = vld [vmem:[%s2943_s0] sm:$0xff]   ;;  %v2281_v5 = vld [vmem:[%s2943_s0 + $0x8] sm:$0xff]  }
   0x3   :  { %2269 = vmatpush3.bf16.msra.mxu1 %v2275_v0  ;;  %2052 = vmatpush3.bf16.msra.mxu0 %v2275_v0  ;;  %v2478_v6 = vld [vmem:[%s2944_s2] sm:$0xff]   ;;  %v2489_v8 = vld [vmem:[%s2944_s2 + $0x8] sm:$0xff]  }
   0x4   :  { %2268 = vmatprep.subr.bf16.mxu1 %v2276_v1  ;;  %2053 = vmatprep.subr.bf16.mxu0 %v2276_v1  ;;  %v189_v9 = vld [vmem:[%s2945_s9] sm:$0xff]  ;;  %v2545_v48 = vld [vmem:[%s2948_s5 + $0x8] sm:$0xff]  }
   0x5   :  { %2059 = vmatprep.mubr.msk.bf16.mxu1 %vm92_vm0, %v2277_v2  ;;  %2055 = vmatprep.mubr.msk.bf16.mxu0 %vm92_vm0, %v2280_v4  ;;  %v195_v10 = vpack.c.bf16 %v189_v9, %v189_v9  ;;  %v1884_v11 = vld [vmem:[%s2946_s3] ss:$0 sm:$0xff]  ;;  %s2389_s3 = smov 64   ;;  %v1896_v49 = vld [vmem:[%s2945_s9 + $0x8] sm:$0xff] }
   0x6   :  { %v190_v39 = vld [vmem:[%s2947_s10] sm:$0xff]  ;;  %v196_v50 = vpack.c.bf16 %v1896_v49, %v1896_v49  ;;  %v2570_v56 = vld [vmem:[%s2949_s4 + $0x8] sm:$0xff]  }
   0x7   :  { %2270 = vmatpush3.bf16.msra.mxu1 %v2276_v1  ;;  %2054 = vmatpush3.bf16.msra.mxu0 %v2276_v1  ;;  %v2537_v46 = vld [vmem:[%s2948_s5] sm:$0xff]  }
   0x8   :  { %2063 = vmatprep.subr.bf16.mxu1 %v2387_v7  ;;  %2079 = vmatprep.subr.bf16.mxu0 %v2387_v7  ;;  %v2563_v54 = vld [vmem:[%s2949_s4] sm:$0xff]  }
   0xa   :  { %2060 = vmatmul.mubr.msk.bf16.vlgmr.msra.gmra.mrb[0].mxu1 %vm92_vm0, %v2278_v3  ;;  %2056 = vmatmul.mubr.msk.bf16.vlgmr.msra.gmra.mrb[0].mxu0 %vm92_vm0, %v2281_v5  ;;  %v2588_v3 = vld [vmem:[%s2950_s6] ss:$0 sm:$0xff] }
   0xb   :  { %2064 = vmatpush3.bf16.msra.mxu1 %v2478_v6  ;;  %2067 = vmatprep.mubr.msk.bf16.mxu1 %vm2388_vm1, %v2387_v7 }
   0xc   :  { %2065 = vmatprep.subr.bf16.mxu1 %v2387_v7  ;;  %2083 = vmatprep.mubr.msk.bf16.mxu0 %vm2388_vm1, %v2387_v7 }
   0xd   :  { %2080 = vmatpush3.bf16.msra.mxu0 %v2537_v46 }
   0xe   :  { %2081 = vmatprep.subr.bf16.mxu0 %v2387_v7 }
   0xf   :  { %2066 = vmatpush3.bf16.msra.mxu1 %v2489_v8 }
  0x10   :  { %2071 = vmatprep.subr.bf16.mxu1 %v2387_v7 }
  0x11   :  { %2082 = vmatpush3.bf16.msra.mxu0 %v2545_v48 }
  0x12   :  { %2068 = vmatmul.mubr.msk.bf16.vlgmr.msra.gmra.mrb[4].mxu1 %vm92_vm0, %v195_v10  ;;  %2095 = vmatprep.subr.bf16.mxu0 %v2387_v7 }
  0x13   :  { %2072 = vmatpush3.bf16.msra.mxu1 %v2478_v6  ;;  %2075 = vmatprep.mubr.msk.bf16.mxu1 %vm2388_vm1, %v2387_v7 }
  0x14   :  { %2073 = vmatprep.subr.bf16.mxu1 %v2387_v7  ;;  %2084 = vmatmul.mubr.msk.bf16.vlgmr.msra.gmra.mrb[4].mxu0 %vm92_vm0, %v196_v50 }
  0x15   :  { %2096 = vmatpush3.bf16.msra.mxu0 %v2478_v6  ;;  %2099 = vmatprep.mubr.msk.bf16.mxu0 %vm2388_vm1, %v2387_v7 }
  0x16   :  { %2097 = vmatprep.subr.bf16.mxu0 %v2387_v7 }
  0x17   :  { %2074 = vmatpush3.bf16.msra.mxu1 %v2489_v8 }
  0x18   :  { %2087 = vmatprep.subr.bf16.mxu1 %v2387_v7 }
  0x19   :  { %2098 = vmatpush3.bf16.msra.mxu0 %v2489_v8 }
  0x1a   :  { %2111 = vmatprep.subr.bf16.mxu0 %v2387_v7 }
  0xdd   :  { %v2061_v12 = vpop.f32.mrb[0].mxu1  ;;  %v2057_v13 = vpop.f32.mrb[0].mxu0 }
  0xde   :  { %v2511_v14 = vadd.f32 %v2061_v12, %v1884_v11  ;;  %v155_v15 = vpop.f32.mrb[1].mxu1  ;;  %v2513_v16 = vadd.f32 %v2057_v13, %v1884_v11  ;;  %v139_v17 = vpop.f32.mrb[1].mxu0 }
  0xdf   :  { %v2515_v18 = vadd.f32 %v1884_v11, %v155_v15  ;;  %v2062_v19 = vpop.f32.mrb[2].mxu1  ;;  %v2058_v20 = vpop.f32.mrb[2].mxu0  ;;  %v140_v27 = vadd.f32 %v1884_v11, %v139_v17 }
  0xe0   :  { %v2517_v21 = vadd.f32 %v2062_v19, %v1884_v11  ;;  %v158_v22 = vpop.f32.mrb[3].mxu1  ;;  %v2519_v23 = vadd.f32 %v2058_v20, %v1884_v11  ;;  %v142_v24 = vpop.f32.mrb[3].mxu0 }
  0xe1   :  { %v2521_v25 = vadd.f32 %v1884_v11, %v158_v22  ;;  %v2523_v26 = vadd.f32 %v1884_v11, %v142_v24 }
  0xe5   :  { %v246_v28 = vpop.f32.mrb[4].mxu1 }
  0xe6   :  { %v252_v29 = vadd.f32 %v246_v28, %v140_v27  ;;  %v2069_v30 = vpop.f32.mrb[5].mxu1 }
  0xe7   :  { %v249_v31 = vpop.f32.mrb[6].mxu1  ;;  %v379_v57 = vpop.f32.mrb[4].mxu0  ;;  %v1897_v30 = vld [vmem:[%s2947_s10 + $0x8] sm:$0xff] }
  0xe8   :  { %v1901_v32 = vmul.f32 -1.442695, %v252_v29  ;;  %v2070_v33 = vpop.f32.mrb[7].mxu1  ;;  %v2085_v58 = vpop.f32.mrb[5].mxu0 }
  0xe9   :  { %v382_v59 = vpop.f32.mrb[6].mxu0 }
  0xea   :  { %2289 = vpow2.f32 %v1901_v32  ;;  %v2086_v60 = vpop.f32.mrb[7].mxu0 }
  0xf4   :  { %v2290_v34 = vpop.eup %2289 }
  0xf5   :  { %v256_v35 = vadd.f32 1.0, %v2290_v34 }
  0xf7   :  { %2291 = vrcp.f32 %v256_v35 }
 0x101   :  { %v2292_v36 = vpop.eup %2291 }
 0x102   :  { %v259_v37 = vmul.f32 2.0, %v2292_v36 }
 0x104   :  { %v1902_v38 = vadd.f32 -1.0, %v259_v37 }
 0x106   :  { %267 = vrot.lane.b32.xlu0 %v1902_v38, %s2389_s3 }
 0x10a   :  { %262 = vrot.lane.b32.xlu0 %v190_v39, %s2390_s22 }
 0x178   :  { %v268_v40 = vpop.permute.xlu0 %267 }
 0x179   :  { %v270_v41 = vmul.f32 %v2292_v36, %v268_v40 }
 0x17b   :  { %272 = vrot.lane.b32.xlu1 %v270_v41, %s2390_s22 }
 0x17c   :  { %v263_v42 = vpop.permute.xlu0 %262 }
 0x17d   :  { %v265_v43 = vmul.f32 %v2292_v36, %v263_v42 }
 0x1ed   :  { %v273_v44 = vpop.permute.xlu1 %272 }
 0x1ee   :  { %v2531_v45 = vadd.f32 %v273_v44, %v265_v43 }
 0x1f0   :  { %2293 = vtanh.f32 %v2531_v45 }
 0x1fa   :  { %v2294_v47 = vpop.eup %2293 }
 0x1fb   :  { %278 = vrot.lane.b32.xlu1 %v2294_v47, %s2389_s3 }
 0x26d   :  { %v279_v51 = vpop.permute.xlu1 %278 }
 0x26e   :  { %v281_v52 = vmul.f32 %v2292_v36, %v279_v51 }
 0x270   :  { %v282_v53 = vpack.c.bf16 %v281_v52, %v281_v52 }
 0x272   :  { %284 = vrot.lane.b32.xlu0 %v282_v53, %s2390_s22 }
 0x2e4   :  { %v285_v55 = vpop.permute.xlu0 %284 }
 0x2e5   :  { %2076 = vmatmul.mubr.msk.bf16.vlgmr.msra.gmra.mrb[8].mxu1 %vm92_vm0, %v285_v55 }
 0x2e6   :  { %2088 = vmatpush3.bf16.msra.mxu1 %v2563_v54  ;;  %2091 = vmatprep.mubr.msk.bf16.mxu1 %vm2388_vm1, %v2387_v7 }
 0x2e7   :  { %2089 = vmatprep.subr.bf16.mxu1 %v2387_v7 }
 0x2ea   :  { %2090 = vmatpush3.bf16.msra.mxu1 %v2570_v56 }
 0x2eb   :  { %2103 = vmatprep.subr.bf16.mxu1 %v2387_v7 }
 0x2ed   :  { %2092 = vmatmul.mubr.msk.bf16.vlgmr.msra.gmra.mrb[12].mxu1 %vm92_vm0, %v285_v55 }
 0x2ee   :  { %2104 = vmatpush3.bf16.msra.mxu1 %v2537_v46  ;;  %2107 = vmatprep.mubr.msk.bf16.mxu1 %vm2388_vm1, %v2387_v7 }
 0x2ef   :  { %2105 = vmatprep.subr.bf16.mxu1 %v2387_v7 }
 0x2f2   :  { %2106 = vmatpush3.bf16.msra.mxu1 %v2545_v48 }
 0x2f3   :  { %2119 = vmatprep.subr.bf16.mxu1 %v2387_v7 }
 0x3b8   :  { %v323_v61 = vpop.f32.mrb[8].mxu1 }
 0x3b9   :  { %v329_v62 = vadd.f32 %v323_v61, %v2523_v26  ;;  %v2077_v63 = vpop.f32.mrb[9].mxu1 }
 0x3ba   :  { %v326_v0 = vpop.f32.mrb[10].mxu1 }
 0x3bb   :  { %v1910_v1 = vmul.f32 -1.442695, %v329_v62  ;;  %v2078_v2 = vpop.f32.mrb[11].mxu1 }
 0x3bd   :  { %2295 = vpow2.f32 %v1910_v1 }
 0x3c0   :  { %v431_v4 = vpop.f32.mrb[12].mxu1 }
 0x3c1   :  { %v432_v5 = vadd.f32 %v431_v4, %v379_v57  ;;  %v2093_v9 = vpop.f32.mrb[13].mxu1 }
 0x3c2   :  { %v434_v10 = vpop.f32.mrb[14].mxu1 }
 0x3c3   :  { %v437_v11 = vadd.f32 %v2588_v3, %v432_v5  ;;  %v2094_v12 = vpop.f32.mrb[15].mxu1 }
 0x3c5   :  { %v1912_v13 = vmul.f32 -1.442695, %v437_v11 }
 0x3c7   :  { %v2296_v15 = vpop.eup %2295  ;;  %2297 = vpow2.f32 %v1912_v13 }
 0x3c8   :  { %v441_v17 = vadd.f32 1.0, %v2296_v15 }
 0x3ca   :  { %2299 = vrcp.f32 %v441_v17 }
 0x3d1   :  { %v2298_v19 = vpop.eup %2297 }
 0x3d2   :  { %v466_v20 = vadd.f32 1.0, %v2298_v19 }
 0x3d4   :  { %v2300_v22 = vpop.eup %2299  ;;  %2301 = vrcp.f32 %v466_v20 }
 0x3d5   :  { %v444_v24 = vmul.f32 2.0, %v2300_v22  ;;  %v446_v35 = vmul.f32 %v2300_v22, %v2531_v45 }
 0x3d7   :  { %v1911_v26 = vadd.f32 -1.0, %v444_v24 }
 0x3d9   :  { %448 = vrot.lane.b32.xlu1 %v1911_v26, %s2389_s3 }
 0x3de   :  { %v2302_v27 = vpop.eup %2301 }
 0x3df   :  { %v469_v28 = vmul.f32 2.0, %v2302_v27 }
 0x3e1   :  { %v1913_v29 = vadd.f32 -1.0, %v469_v28 }
 0x3e3   :  { %477 = vrot.lane.b32.xlu0 %v1913_v29, %s2389_s3 }
 0x3e7   :  { %472 = vrot.lane.b32.xlu0 %v1897_v30, %s2390_s22 }
 0x44b   :  { %v449_v31 = vpop.permute.xlu1 %448 }
 0x44c   :  { %v451_v32 = vmul.f32 %v2300_v22, %v449_v31 }
 0x44e   :  { %453 = vrot.lane.b32.xlu1 %v451_v32, %s2390_s22 }
 0x455   :  { %v478_v33 = vpop.permute.xlu0 %477 }
 0x456   :  { %v480_v34 = vmul.f32 %v2302_v27, %v478_v33 }
 0x458   :  { %482 = vrot.lane.b32.xlu1 %v480_v34, %s2390_s22 }
 0x459   :  { %v473_v38 = vpop.permute.xlu0 %472 }
 0x45a   :  { %v475_v39 = vmul.f32 %v2302_v27, %v473_v38 }
 0x4c0   :  { %v454_v36 = vpop.permute.xlu1 %453 }
 0x4c1   :  { %v2600_v37 = vadd.f32 %v454_v36, %v446_v35 }
 0x4c3   :  { %2303 = vtanh.f32 %v2600_v37 }
 0x4ca   :  { %v483_v40 = vpop.permute.xlu1 %482 }
 0x4cb   :  { %v2603_v41 = vadd.f32 %v483_v40, %v475_v39 }
 0x4cd   :  { %v2304_v42 = vpop.eup %2303  ;;  %2305 = vtanh.f32 %v2603_v41 }
 0x4ce   :  { %459 = vrot.lane.b32.xlu0 %v2304_v42, %s2389_s3 }
 0x4d7   :  { %v2306_v43 = vpop.eup %2305 }
 0x4d8   :  { %488 = vrot.lane.b32.xlu1 %v2306_v43, %s2389_s3 }
 0x540   :  { %v460_v44 = vpop.permute.xlu0 %459 }
 0x541   :  { %v462_v45 = vmul.f32 %v2300_v22, %v460_v44 }
 0x543   :  { %v492_v47 = vpack.c.bf16 %v462_v45, %v462_v45 }
 0x545   :  { %495 = vrot.lane.b32.xlu0 %v492_v47, %s2390_s22 }
 0x54a   :  { %v489_v49 = vpop.permute.xlu1 %488 }
 0x54b   :  { %v2609_v50 = vmul.f32 %v2302_v27, %v489_v49 }
 0x54d   :  { %v493_v51 = vpack.c.bf16 %v2609_v50, %v2609_v50 }
 0x54f   :  { %542 = vrot.lane.b32.xlu1 %v493_v51, %s2390_s22 }
 0x5b7   :  { %v496_v52 = vpop.permute.xlu0 %495 }
 0x5b8   :  { %2100 = vmatmul.mubr.msk.bf16.vlgmr.msra.gmra.mrb[8].mxu0 %vm92_vm0, %v496_v52 }
 0x5b9   :  { %2112 = vmatpush3.bf16.msra.mxu0 %v2563_v54  ;;  %2115 = vmatprep.mubr.msk.bf16.mxu0 %vm2388_vm1, %v2387_v7 }
 0x5ba   :  { %2113 = vmatprep.subr.bf16.mxu0 %v2387_v7 }
 0x5bd   :  { %2114 = vmatpush3.bf16.msra.mxu0 %v2570_v56 }
 0x5be   :  { %2127 = vmatprep.subr.bf16.mxu0 %v2387_v7 }
 0x5c0   :  { %2116 = vmatmul.mubr.msk.bf16.vlgmr.msra.gmra.mrb[12].mxu0 %vm92_vm0, %v496_v52 }
 0x5c1   :  { %v543_v53 = vpop.permute.xlu1 %542  ;;  %2128 = vmatpush3.bf16.msra.mxu0 %v2537_v46  ;;  %2131 = vmatprep.mubr.msk.bf16.mxu0 %vm2388_vm1, %v2387_v7 }
 0x5c2   :  { %2108 = vmatmul.mubr.msk.bf16.vlgmr.msra.gmra.mrb[16].mxu1 %vm92_vm0, %v543_v53  ;;  %2129 = vmatprep.subr.bf16.mxu0 %v2387_v7 }
 0x5c3   :  { %2120 = vmatpush3.bf16.msra.mxu1 %v2478_v6  ;;  %2123 = vmatprep.mubr.msk.bf16.mxu1 %vm2388_vm1, %v2387_v7 }
 0x5c4   :  { %2121 = vmatprep.subr.bf16.mxu1 %v2387_v7 }
 0x5c5   :  { %2130 = vmatpush3.bf16.msra.mxu0 %v2545_v48 }
 0x5c6   :  { %2143 = vmatprep.subr.bf16.mxu0 %v2387_v7 }
 0x5c7   :  { %2122 = vmatpush3.bf16.msra.mxu1 %v2489_v8 }
 0x5c8   :  { %2135 = vmatprep.subr.bf16.mxu1 %v2387_v7 }
 0x68b   :  { %v534_v55 = vpop.f32.mrb[8].mxu0 }
 0x68c   :  { %v540_v57 = vadd.f32 %v534_v55, %v2513_v16  ;;  %v2101_v58 = vpop.f32.mrb[9].mxu0 }
 0x68d   :  { %v537_v59 = vpop.f32.mrb[10].mxu0 }
 0x68e   :  { %v1917_v60 = vmul.f32 -1.442695, %v540_v57  ;;  %v2102_v61 = vpop.f32.mrb[11].mxu0 }
 0x690   :  { %2307 = vpow2.f32 %v1917_v60 }
 0x693   :  { %v621_v62 = vpop.f32.mrb[12].mxu0 }
 0x694   :  { %v2117_v63 = vpop.f32.mrb[13].mxu0 }
 0x695   :  { %v581_v0 = vpop.f32.mrb[16].mxu1  ;;  %v624_v1 = vpop.f32.mrb[14].mxu0 }
 0x696   :  { %v622_v2 = vadd.f32 %v621_v62, %v581_v0  ;;  %v2109_v4 = vpop.f32.mrb[17].mxu1  ;;  %v2118_v5 = vpop.f32.mrb[15].mxu0 }
 0x697   :  { %v584_v9 = vpop.f32.mrb[18].mxu1 }
 0x698   :  { %v627_v10 = vadd.f32 %v2588_v3, %v622_v2  ;;  %v2110_v11 = vpop.f32.mrb[19].mxu1 }
 0x69a   :  { %v2308_v12 = vpop.eup %2307  ;;  %v1919_v13 = vmul.f32 -1.442695, %v627_v10 }
 0x69b   :  { %v631_v15 = vadd.f32 1.0, %v2308_v12 }
 0x69c   :  { %2309 = vpow2.f32 %v1919_v13 }
 0x69d   :  { %2311 = vrcp.f32 %v631_v15 }
 0x6a6   :  { %v2310_v16 = vpop.eup %2309 }
 0x6a7   :  { %v2312_v17 = vpop.eup %2311  ;;  %v656_v19 = vadd.f32 1.0, %v2310_v16 }
 0x6a8   :  { %v634_v20 = vmul.f32 2.0, %v2312_v17  ;;  %v636_v32 = vmul.f32 %v2312_v17, %v2600_v37 }
 0x6a9   :  { %2313 = vrcp.f32 %v656_v19 }
 0x6aa   :  { %v1918_v22 = vadd.f32 -1.0, %v634_v20 }
 0x6ac   :  { %638 = vrot.lane.b32.xlu0 %v1918_v22, %s2389_s3 }
 0x6b3   :  { %v2314_v24 = vpop.eup %2313 }
 0x6b4   :  { %v659_v26 = vmul.f32 2.0, %v2314_v24  ;;  %v661_v35 = vmul.f32 %v2314_v24, %v2603_v41 }
 0x6b6   :  { %v1920_v27 = vadd.f32 -1.0, %v659_v26 }
 0x6b8   :  { %663 = vrot.lane.b32.xlu1 %v1920_v27, %s2389_s3 }
 0x71e   :  { %v639_v28 = vpop.permute.xlu0 %638 }
 0x71f   :  { %v641_v29 = vmul.f32 %v2312_v17, %v639_v28 }
 0x721   :  { %643 = vrot.lane.b32.xlu0 %v641_v29, %s2390_s22 }
 0x72a   :  { %v664_v30 = vpop.permute.xlu1 %663 }
 0x72b   :  { %v666_v31 = vmul.f32 %v2314_v24, %v664_v30 }
 0x72d   :  { %668 = vrot.lane.b32.xlu1 %v666_v31, %s2390_s22 }
 0x793   :  { %v644_v33 = vpop.permute.xlu0 %643 }
 0x794   :  { %v2642_v34 = vadd.f32 %v644_v33, %v636_v32 }
 0x796   :  { %2315 = vtanh.f32 %v2642_v34 }
 0x79f   :  { %v669_v36 = vpop.permute.xlu1 %668 }
 0x7a0   :  { %v2316_v38 = vpop.eup %2315  ;;  %v2646_v39 = vadd.f32 %v669_v36, %v661_v35 }
 0x7a1   :  { %649 = vrot.lane.b32.xlu0 %v2316_v38, %s2389_s3 }
 0x7a2   :  { %2317 = vtanh.f32 %v2646_v39 }
 0x7ac   :  { %v2318_v40 = vpop.eup %2317 }
 0x7ad   :  { %674 = vrot.lane.b32.xlu1 %v2318_v40, %s2389_s3 }
 0x813   :  { %v650_v42 = vpop.permute.xlu0 %649 }
 0x814   :  { %v652_v37 = vmul.f32 %v2312_v17, %v650_v42 }
 0x816   :  { %v678_v43 = vpack.c.bf16 %v652_v37, %v652_v37 }
 0x818   :  { %681 = vrot.lane.b32.xlu0 %v678_v43, %s2390_s22 }
 0x81f   :  { %v675_v44 = vpop.permute.xlu1 %674 }
 0x820   :  { %v2652_v45 = vmul.f32 %v2314_v24, %v675_v44 }
 0x822   :  { %v679_v41 = vpack.c.bf16 %v2652_v45, %v2652_v45 }
 0x824   :  { %728 = vrot.lane.b32.xlu1 %v679_v41, %s2390_s22 }
 0x88a   :  { %v682_v47 = vpop.permute.xlu0 %681 }
 0x88b   :  { %2124 = vmatmul.mubr.msk.bf16.vlgmr.msra.gmra.mrb[20].mxu1 %vm92_vm0, %v682_v47 }
 0x88c   :  { %2136 = vmatpush3.bf16.msra.mxu1 %v2563_v54  ;;  %2139 = vmatprep.mubr.msk.bf16.mxu1 %vm2388_vm1, %v2387_v7 }
 0x88d   :  { %2137 = vmatprep.subr.bf16.mxu1 %v2387_v7 }
 0x890   :  { %2138 = vmatpush3.bf16.msra.mxu1 %v2570_v56 }
 0x891   :  { %2151 = vmatprep.subr.bf16.mxu1 %v2387_v7 }
 0x893   :  { %2140 = vmatmul.mubr.msk.bf16.vlgmr.msra.gmra.mrb[24].mxu1 %vm92_vm0, %v682_v47 }
 0x894   :  { %2152 = vmatpush3.bf16.msra.mxu1 %v2537_v46  ;;  %2155 = vmatprep.mubr.msk.bf16.mxu1 %vm2388_vm1, %v2387_v7 }
 0x895   :  { %2153 = vmatprep.subr.bf16.mxu1 %v2387_v7 }
 0x896   :  { %v729_v49 = vpop.permute.xlu1 %728 }
 0x897   :  { %2132 = vmatmul.mubr.msk.bf16.vlgmr.msra.gmra.mrb[16].mxu0 %vm92_vm0, %v729_v49 }
 0x898   :  { %2144 = vmatpush3.bf16.msra.mxu0 %v2478_v6  ;;  %2147 = vmatprep.mubr.msk.bf16.mxu0 %vm2388_vm1, %v2387_v7 }
 0x899   :  { %2145 = vmatprep.subr.bf16.mxu0 %v2387_v7  ;;  %2154 = vmatpush3.bf16.msra.mxu1 %v2545_v48 }
 0x89a   :  { %2167 = vmatprep.subr.bf16.mxu1 %v2387_v7 }
 0x89c   :  { %2146 = vmatpush3.bf16.msra.mxu0 %v2489_v8 }
 0x89d   :  { %2159 = vmatprep.subr.bf16.mxu0 %v2387_v7 }
 0x95e   :  { %v720_v51 = vpop.f32.mrb[20].mxu1 }
 0x95f   :  { %v726_v52 = vadd.f32 %v720_v51, %v2519_v23  ;;  %v2125_v53 = vpop.f32.mrb[21].mxu1 }
 0x960   :  { %v723_v55 = vpop.f32.mrb[22].mxu1 }
 0x961   :  { %v1924_v57 = vmul.f32 -1.442695, %v726_v52  ;;  %v2126_v58 = vpop.f32.mrb[23].mxu1 }
 0x963   :  { %2319 = vpow2.f32 %v1924_v57 }
 0x966   :  { %v807_v59 = vpop.f32.mrb[24].mxu1 }
 0x967   :  { %v2141_v60 = vpop.f32.mrb[25].mxu1 }
 0x968   :  { %v810_v61 = vpop.f32.mrb[26].mxu1 }
 0x969   :  { %v2142_v62 = vpop.f32.mrb[27].mxu1 }
 0x96a   :  { %v767_v63 = vpop.f32.mrb[16].mxu0 }
 0x96b   :  { %v808_v0 = vadd.f32 %v807_v59, %v767_v63  ;;  %v2133_v1 = vpop.f32.mrb[17].mxu0 }
 0x96c   :  { %v770_v2 = vpop.f32.mrb[18].mxu0 }
 0x96d   :  { %v2320_v4 = vpop.eup %2319  ;;  %v813_v5 = vadd.f32 %v2588_v3, %v808_v0  ;;  %v2134_v9 = vpop.f32.mrb[19].mxu0 }
 0x96e   :  { %v817_v10 = vadd.f32 1.0, %v2320_v4 }
 0x96f   :  { %v1926_v11 = vmul.f32 -1.442695, %v813_v5 }
 0x970   :  { %2321 = vrcp.f32 %v817_v10 }
 0x971   :  { %2323 = vpow2.f32 %v1926_v11 }
 0x97a   :  { %v2322_v23 = vpop.eup %2321 }
 0x97b   :  { %v2324_v12 = vpop.eup %2323  ;;  %v820_v13 = vmul.f32 2.0, %v2322_v23  ;;  %v822_v28 = vmul.f32 %v2322_v23, %v2642_v34 }
 0x97c   :  { %v842_v15 = vadd.f32 1.0, %v2324_v12 }
 0x97d   :  { %v1925_v16 = vadd.f32 -1.0, %v820_v13 }
 0x97e   :  { %2325 = vrcp.f32 %v842_v15 }
 0x97f   :  { %824 = vrot.lane.b32.xlu0 %v1925_v16, %s2389_s3 }
 0x988   :  { %v2326_v17 = vpop.eup %2325 }
 0x989   :  { %v845_v19 = vmul.f32 2.0, %v2326_v17  ;;  %v847_v32 = vmul.f32 %v2326_v17, %v2646_v39 }
 0x98b   :  { %v1927_v20 = vadd.f32 -1.0, %v845_v19 }
 0x98d   :  { %849 = vrot.lane.b32.xlu1 %v1927_v20, %s2389_s3 }
 0x9f1   :  { %v825_v22 = vpop.permute.xlu0 %824 }
 0x9f2   :  { %v827_v24 = vmul.f32 %v2322_v23, %v825_v22 }
 0x9f4   :  { %829 = vrot.lane.b32.xlu0 %v827_v24, %s2390_s22 }
 0x9ff   :  { %v850_v26 = vpop.permute.xlu1 %849 }
 0xa00   :  { %v852_v27 = vmul.f32 %v2326_v17, %v850_v26 }
 0xa02   :  { %854 = vrot.lane.b32.xlu1 %v852_v27, %s2390_s22 }
 0xa66   :  { %v830_v29 = vpop.permute.xlu0 %829 }
 0xa67   :  { %v2685_v30 = vadd.f32 %v830_v29, %v822_v28 }
 0xa69   :  { %2327 = vtanh.f32 %v2685_v30 }
 0xa73   :  { %v2328_v31 = vpop.eup %2327 }
 0xa74   :  { %835 = vrot.lane.b32.xlu0 %v2328_v31, %s2389_s3  ;;  %v855_v33 = vpop.permute.xlu1 %854 }
 0xa75   :  { %v2690_v35 = vadd.f32 %v855_v33, %v847_v32 }
 0xa77   :  { %2329 = vtanh.f32 %v2690_v35 }
 0xa81   :  { %v2330_v36 = vpop.eup %2329 }
 0xa82   :  { %860 = vrot.lane.b32.xlu1 %v2330_v36, %s2389_s3 }
 0xae6   :  { %v836_v38 = vpop.permute.xlu0 %835 }
 0xae7   :  { %v838_v34 = vmul.f32 %v2322_v23, %v836_v38 }
 0xae9   :  { %v864_v40 = vpack.c.bf16 %v838_v34, %v838_v34 }
 0xaeb   :  { %867 = vrot.lane.b32.xlu0 %v864_v40, %s2390_s22 }
 0xaf4   :  { %v861_v42 = vpop.permute.xlu1 %860 }
 0xaf5   :  { %v2695_v37 = vmul.f32 %v2326_v17, %v861_v42 }
 0xaf7   :  { %v865_v39 = vpack.c.bf16 %v2695_v37, %v2695_v37 }
 0xaf9   :  { %914 = vrot.lane.b32.xlu1 %v865_v39, %s2390_s22 }
 0xb5d   :  { %v868_v43 = vpop.permute.xlu0 %867 }
 0xb5e   :  { %2148 = vmatmul.mubr.msk.bf16.vlgmr.msra.gmra.mrb[20].mxu0 %vm92_vm0, %v868_v43 }
 0xb5f   :  { %2160 = vmatpush3.bf16.msra.mxu0 %v2563_v54  ;;  %2163 = vmatprep.mubr.msk.bf16.mxu0 %vm2388_vm1, %v2387_v7 }
 0xb60   :  { %2161 = vmatprep.subr.bf16.mxu0 %v2387_v7 }
 0xb63   :  { %2162 = vmatpush3.bf16.msra.mxu0 %v2570_v56 }
 0xb64   :  { %2175 = vmatprep.subr.bf16.mxu0 %v2387_v7 }
 0xb66   :  { %2164 = vmatmul.mubr.msk.bf16.vlgmr.msra.gmra.mrb[24].mxu0 %vm92_vm0, %v868_v43 }
 0xb67   :  { %2176 = vmatpush3.bf16.msra.mxu0 %v2537_v46  ;;  %2179 = vmatprep.mubr.msk.bf16.mxu0 %vm2388_vm1, %v2387_v7 }
 0xb68   :  { %2177 = vmatprep.subr.bf16.mxu0 %v2387_v7 }
 0xb6b   :  { %v915_v44 = vpop.permute.xlu1 %914  ;;  %2178 = vmatpush3.bf16.msra.mxu0 %v2545_v48 }
 0xb6c   :  { %2156 = vmatmul.mubr.msk.bf16.vlgmr.msra.gmra.mrb[28].mxu1 %vm92_vm0, %v915_v44  ;;  %2191 = vmatprep.subr.bf16.mxu0 %v2387_v7 }
 0xb6d   :  { %2168 = vmatpush3.bf16.msra.mxu1 %v2478_v6  ;;  %2171 = vmatprep.mubr.msk.bf16.mxu1 %vm2388_vm1, %v2387_v7 }
 0xb6e   :  { %2169 = vmatprep.subr.bf16.mxu1 %v2387_v7 }
 0xb71   :  { %2170 = vmatpush3.bf16.msra.mxu1 %v2489_v8 }
 0xb72   :  { %2183 = vmatprep.subr.bf16.mxu1 %v2387_v7 }
 0xc31   :  { %v906_v41 = vpop.f32.mrb[20].mxu0 }
 0xc32   :  { %v912_v47 = vadd.f32 %v906_v41, %v2515_v18  ;;  %v2149_v49 = vpop.f32.mrb[21].mxu0 }
 0xc33   :  { %v909_v51 = vpop.f32.mrb[22].mxu0 }
 0xc34   :  { %v1931_v52 = vmul.f32 -1.442695, %v912_v47  ;;  %v2150_v53 = vpop.f32.mrb[23].mxu0 }
 0xc36   :  { %2331 = vpow2.f32 %v1931_v52 }
 0xc39   :  { %v993_v55 = vpop.f32.mrb[24].mxu0 }
 0xc3a   :  { %v2165_v57 = vpop.f32.mrb[25].mxu0 }
 0xc3b   :  { %v996_v58 = vpop.f32.mrb[26].mxu0 }
 0xc3c   :  { %v2166_v59 = vpop.f32.mrb[27].mxu0 }
 0xc3f   :  { %v953_v60 = vpop.f32.mrb[28].mxu1 }
 0xc40   :  { %v2332_v61 = vpop.eup %2331  ;;  %v994_v62 = vadd.f32 %v993_v55, %v953_v60  ;;  %v2157_v63 = vpop.f32.mrb[29].mxu1 }
 0xc41   :  { %v1003_v0 = vadd.f32 1.0, %v2332_v61  ;;  %v956_v1 = vpop.f32.mrb[30].mxu1 }
 0xc42   :  { %v999_v2 = vadd.f32 %v2588_v3, %v994_v62  ;;  %v2158_v4 = vpop.f32.mrb[31].mxu1 }
 0xc43   :  { %2333 = vrcp.f32 %v1003_v0 }
 0xc44   :  { %v1933_v18 = vmul.f32 -1.442695, %v999_v2 }
 0xc46   :  { %2335 = vpow2.f32 %v1933_v18 }
 0xc4d   :  { %v2334_v5 = vpop.eup %2333 }
 0xc4e   :  { %v1006_v9 = vmul.f32 2.0, %v2334_v5  ;;  %v1008_v22 = vmul.f32 %v2334_v5, %v2685_v30 }
 0xc50   :  { %v2336_v10 = vpop.eup %2335  ;;  %v1932_v11 = vadd.f32 -1.0, %v1006_v9 }
 0xc51   :  { %v1028_v23 = vadd.f32 1.0, %v2336_v10 }
 0xc52   :  { %1010 = vrot.lane.b32.xlu0 %v1932_v11, %s2389_s3 }
 0xc53   :  { %2337 = vrcp.f32 %v1028_v23 }
 0xc5d   :  { %v2338_v12 = vpop.eup %2337 }
 0xc5e   :  { %v1031_v13 = vmul.f32 2.0, %v2338_v12  ;;  %v1033_v28 = vmul.f32 %v2338_v12, %v2690_v35 }
 0xc60   :  { %v1934_v15 = vadd.f32 -1.0, %v1031_v13 }
 0xc62   :  { %1035 = vrot.lane.b32.xlu1 %v1934_v15, %s2389_s3 }
 0xcc4   :  { %v1011_v16 = vpop.permute.xlu0 %1010 }
 0xcc5   :  { %v1013_v17 = vmul.f32 %v2334_v5, %v1011_v16 }
 0xcc7   :  { %1015 = vrot.lane.b32.xlu0 %v1013_v17, %s2390_s22 }
 0xcd4   :  { %v1036_v19 = vpop.permute.xlu1 %1035 }
 0xcd5   :  { %v1038_v20 = vmul.f32 %v2338_v12, %v1036_v19 }
 0xcd7   :  { %1040 = vrot.lane.b32.xlu1 %v1038_v20, %s2390_s22 }
 0xd39   :  { %v1016_v24 = vpop.permute.xlu0 %1015 }
 0xd3a   :  { %v2728_v26 = vadd.f32 %v1016_v24, %v1008_v22 }
 0xd3c   :  { %2339 = vtanh.f32 %v2728_v26 }
 0xd46   :  { %v2340_v27 = vpop.eup %2339 }
 0xd47   :  { %1021 = vrot.lane.b32.xlu0 %v2340_v27, %s2389_s3 }
 0xd49   :  { %v1041_v29 = vpop.permute.xlu1 %1040 }
 0xd4a   :  { %v2733_v31 = vadd.f32 %v1041_v29, %v1033_v28 }
 0xd4c   :  { %2341 = vtanh.f32 %v2733_v31 }
 0xd56   :  { %v2342_v32 = vpop.eup %2341 }
 0xd57   :  { %1046 = vrot.lane.b32.xlu1 %v2342_v32, %s2389_s3 }
 0xdb9   :  { %v1022_v33 = vpop.permute.xlu0 %1021 }
 0xdba   :  { %v1024_v30 = vmul.f32 %v2334_v5, %v1022_v33 }
 0xdbc   :  { %v1050_v36 = vpack.c.bf16 %v1024_v30, %v1024_v30 }
 0xdbe   :  { %1053 = vrot.lane.b32.xlu0 %v1050_v36, %s2390_s22 }
 0xdc9   :  { %v1047_v38 = vpop.permute.xlu1 %1046 }
 0xdca   :  { %v2738_v34 = vmul.f32 %v2338_v12, %v1047_v38 }
 0xdcc   :  { %v1051_v40 = vpack.c.bf16 %v2738_v34, %v2738_v34 }
 0xdce   :  { %1100 = vrot.lane.b32.xlu1 %v1051_v40, %s2390_s22 }
 0xe30   :  { %v1054_v35 = vpop.permute.xlu0 %1053 }
 0xe31   :  { %2172 = vmatmul.mubr.msk.bf16.vlgmr.msra.gmra.mrb[32].mxu1 %vm92_vm0, %v1054_v35 }
 0xe32   :  { %2184 = vmatpush3.bf16.msra.mxu1 %v2563_v54  ;;  %2187 = vmatprep.mubr.msk.bf16.mxu1 %vm2388_vm1, %v2387_v7 }
 0xe33   :  { %2185 = vmatprep.subr.bf16.mxu1 %v2387_v7 }
 0xe36   :  { %2186 = vmatpush3.bf16.msra.mxu1 %v2570_v56 }
 0xe37   :  { %2199 = vmatprep.subr.bf16.mxu1 %v2387_v7 }
 0xe39   :  { %2188 = vmatmul.mubr.msk.bf16.vlgmr.msra.gmra.mrb[36].mxu1 %vm92_vm0, %v1054_v35 }
 0xe3a   :  { %2200 = vmatpush3.bf16.msra.mxu1 %v2537_v46  ;;  %2203 = vmatprep.mubr.msk.bf16.mxu1 %vm2388_vm1, %v2387_v7 }
 0xe3b   :  { %2201 = vmatprep.subr.bf16.mxu1 %v2387_v7 }
 0xe3e   :  { %2202 = vmatpush3.bf16.msra.mxu1 %v2545_v48 }
 0xe3f   :  { %2215 = vmatprep.subr.bf16.mxu1 %v2387_v7 }
 0xe40   :  { %v1101_v42 = vpop.permute.xlu1 %1100 }
 0xe41   :  { %2180 = vmatmul.mubr.msk.bf16.vlgmr.msra.gmra.mrb[28].mxu0 %vm92_vm0, %v1101_v42 }
 0xe42   :  { %2192 = vmatpush3.bf16.msra.mxu0 %v2478_v6  ;;  %2195 = vmatprep.mubr.msk.bf16.mxu0 %vm2388_vm1, %v2387_v7 }
 0xe43   :  { %2193 = vmatprep.subr.bf16.mxu0 %v2387_v7 }
 0xe46   :  { %2194 = vmatpush3.bf16.msra.mxu0 %v2489_v8 }
 0xe47   :  { %2207 = vmatprep.subr.bf16.mxu0 %v2387_v7 }
 0xf04   :  { %v1092_v39 = vpop.f32.mrb[32].mxu1 }
 0xf05   :  { %v1098_v43 = vadd.f32 %v1092_v39, %v2521_v25  ;;  %v2173_v44 = vpop.f32.mrb[33].mxu1 }
 0xf06   :  { %v1095_v41 = vpop.f32.mrb[34].mxu1 }
 0xf07   :  { %v1938_v47 = vmul.f32 -1.442695, %v1098_v43  ;;  %v2174_v49 = vpop.f32.mrb[35].mxu1 }
 0xf09   :  { %2343 = vpow2.f32 %v1938_v47 }
 0xf0c   :  { %v1179_v51 = vpop.f32.mrb[36].mxu1 }
 0xf0d   :  { %v2189_v52 = vpop.f32.mrb[37].mxu1 }
 0xf0e   :  { %v1182_v53 = vpop.f32.mrb[38].mxu1 }
 0xf0f   :  { %v2190_v55 = vpop.f32.mrb[39].mxu1 }
 0xf13   :  { %v2344_v57 = vpop.eup %2343 }
 0xf14   :  { %v1189_v58 = vadd.f32 1.0, %v2344_v57  ;;  %v1139_v59 = vpop.f32.mrb[28].mxu0 }
 0xf15   :  { %v1180_v60 = vadd.f32 %v1179_v51, %v1139_v59  ;;  %v2181_v61 = vpop.f32.mrb[29].mxu0 }
 0xf16   :  { %2345 = vrcp.f32 %v1189_v58  ;;  %v1142_v62 = vpop.f32.mrb[30].mxu0 }
 0xf17   :  { %v1185_v63 = vadd.f32 %v2588_v3, %v1180_v60  ;;  %v2182_v0 = vpop.f32.mrb[31].mxu0 }
 0xf19   :  { %v1940_v25 = vmul.f32 -1.442695, %v1185_v63 }
 0xf1b   :  { %2347 = vpow2.f32 %v1940_v25 }
 0xf20   :  { %v2346_v1 = vpop.eup %2345 }
 0xf21   :  { %v1192_v2 = vmul.f32 2.0, %v2346_v1  ;;  %v1194_v16 = vmul.f32 %v2346_v1, %v2728_v26 }
 0xf23   :  { %v1939_v4 = vadd.f32 -1.0, %v1192_v2 }
 0xf25   :  { %v2348_v18 = vpop.eup %2347  ;;  %1196 = vrot.lane.b32.xlu0 %v1939_v4, %s2389_s3 }
 0xf26   :  { %v1214_v5 = vadd.f32 1.0, %v2348_v18 }
 0xf28   :  { %2349 = vrcp.f32 %v1214_v5 }
 0xf32   :  { %v2350_v9 = vpop.eup %2349 }
 0xf33   :  { %v1217_v10 = vmul.f32 2.0, %v2350_v9  ;;  %v1219_v22 = vmul.f32 %v2350_v9, %v2733_v31 }
 0xf35   :  { %v1941_v11 = vadd.f32 -1.0, %v1217_v10 }
 0xf37   :  { %1221 = vrot.lane.b32.xlu1 %v1941_v11, %s2389_s3 }
 0xf97   :  { %v1197_v23 = vpop.permute.xlu0 %1196 }
 0xf98   :  { %v1199_v12 = vmul.f32 %v2346_v1, %v1197_v23 }
 0xf9a   :  { %1201 = vrot.lane.b32.xlu0 %v1199_v12, %s2390_s22 }
 0xfa9   :  { %v1222_v13 = vpop.permute.xlu1 %1221 }
 0xfaa   :  { %v1224_v15 = vmul.f32 %v2350_v9, %v1222_v13 }
 0xfac   :  { %1226 = vrot.lane.b32.xlu1 %v1224_v15, %s2390_s22 }
0x100c   :  { %v1202_v17 = vpop.permute.xlu0 %1201 }
0x100d   :  { %v2771_v19 = vadd.f32 %v1202_v17, %v1194_v16 }
0x100f   :  { %2351 = vtanh.f32 %v2771_v19 }
0x1019   :  { %v2352_v20 = vpop.eup %2351 }
0x101a   :  { %1207 = vrot.lane.b32.xlu0 %v2352_v20, %s2389_s3 }
0x101e   :  { %v1227_v24 = vpop.permute.xlu1 %1226 }
0x101f   :  { %v2776_v27 = vadd.f32 %v1227_v24, %v1219_v22 }
0x1021   :  { %2353 = vtanh.f32 %v2776_v27 }
0x102b   :  { %v2354_v28 = vpop.eup %2353 }
0x102c   :  { %1232 = vrot.lane.b32.xlu1 %v2354_v28, %s2389_s3 }
0x108c   :  { %v1208_v29 = vpop.permute.xlu0 %1207 }
0x108d   :  { %v1210_v26 = vmul.f32 %v2346_v1, %v1208_v29 }
0x108f   :  { %v1236_v32 = vpack.c.bf16 %v1210_v26, %v1210_v26  ;;  %v2385_v26 = vld [vmem:[%s2948_s5] sm:$0xff]  }
0x1091   :  { %1239 = vrot.lane.b32.xlu0 %v1236_v32, %s2390_s22 }
0x109e   :  { %v1233_v33 = vpop.permute.xlu1 %1232 }
0x109f   :  { %v2781_v30 = vmul.f32 %v2350_v9, %v1233_v33 }
0x10a1   :  { %v1237_v36 = vpack.c.bf16 %v2781_v30, %v2781_v30 }
0x10a3   :  { %1286 = vrot.lane.b32.xlu1 %v1237_v36, %s2390_s22 }
0x1103   :  { %v1240_v31 = vpop.permute.xlu0 %1239 }
0x1104   :  { %2196 = vmatmul.mubr.msk.bf16.vlgmr.msra.gmra.mrb[32].mxu0 %vm92_vm0, %v1240_v31 }
0x1105   :  { %2208 = vmatpush3.bf16.msra.mxu0 %v2563_v54  ;;  %2211 = vmatprep.mubr.msk.bf16.mxu0 %vm2388_vm1, %v2387_v7 }
0x1106   :  { %2209 = vmatprep.subr.bf16.mxu0 %v2387_v7 }
0x1109   :  { %2210 = vmatpush3.bf16.msra.mxu0 %v2570_v56 }
0x110a   :  { %2223 = vmatprep.subr.bf16.mxu0 %v2387_v7 }
0x110c   :  { %2212 = vmatmul.mubr.msk.bf16.vlgmr.msra.gmra.mrb[36].mxu0 %vm92_vm0, %v1240_v31 }
0x110d   :  { %2224 = vmatpush3.bf16.msra.mxu0 %v2537_v46  ;;  %2227 = vmatprep.mubr.msk.bf16.mxu0 %vm2388_vm1, %v2387_v7 }
0x110e   :  { %2225 = vmatprep.subr.bf16.mxu0 %v2387_v7 }
0x1111   :  { %2226 = vmatpush3.bf16.msra.mxu0 %v2545_v48 }
0x1112   :  { %2239 = vmatprep.subr.bf16.mxu0 %v2387_v7 }
0x1115   :  { %v1287_v38 = vpop.permute.xlu1 %1286 }
0x1116   :  { %2204 = vmatmul.mubr.msk.bf16.vlgmr.msra.gmra.mrb[40].mxu1 %vm92_vm0, %v1287_v38 }
0x1117   :  { %2216 = vmatpush3.bf16.msra.mxu1 %v2478_v6  ;;  %2219 = vmatprep.mubr.msk.bf16.mxu1 %vm2388_vm1, %v2387_v7 }
0x1118   :  { %2217 = vmatprep.subr.bf16.mxu1 %v2387_v7 }
0x111b   :  { %2218 = vmatpush3.bf16.msra.mxu1 %v2489_v8 }
0x111c   :  { %2231 = vmatprep.subr.bf16.mxu1 %v2387_v7 }
0x11d7   :  { %v1278_v46 = vpop.f32.mrb[32].mxu0 }
0x11d8   :  { %v1284_v40 = vadd.f32 %v1278_v46, %v2511_v14  ;;  %v2197_v35 = vpop.f32.mrb[33].mxu0 }
0x11d9   :  { %v1281_v42 = vpop.f32.mrb[34].mxu0 }
0x11da   :  { %v1945_v39 = vmul.f32 -1.442695, %v1284_v40  ;;  %v2198_v43 = vpop.f32.mrb[35].mxu0 }
0x11dc   :  { %2355 = vpow2.f32 %v1945_v39 }
0x11df   :  { %v1365_v44 = vpop.f32.mrb[36].mxu0 }
0x11e0   :  { %v2213_v41 = vpop.f32.mrb[37].mxu0 }
0x11e1   :  { %v1368_v6 = vpop.f32.mrb[38].mxu0 }
0x11e2   :  { %v2214_v47 = vpop.f32.mrb[39].mxu0 }
0x11e6   :  { %v2356_v49 = vpop.eup %2355 }
0x11e7   :  { %v1375_v51 = vadd.f32 1.0, %v2356_v49 }
0x11e9   :  { %2357 = vrcp.f32 %v1375_v51  ;;  %v1325_v52 = vpop.f32.mrb[40].mxu1 }
0x11ea   :  { %v1366_v53 = vadd.f32 %v1365_v44, %v1325_v52  ;;  %v2205_v8 = vpop.f32.mrb[41].mxu1 }
0x11eb   :  { %v1328_v55 = vpop.f32.mrb[42].mxu1 }
0x11ec   :  { %v1371_v57 = vadd.f32 %v2588_v3, %v1366_v53  ;;  %v2206_v58 = vpop.f32.mrb[43].mxu1 }
0x11ee   :  { %v1947_v14 = vmul.f32 -1.442695, %v1371_v57 }
0x11f0   :  { %2359 = vpow2.f32 %v1947_v14 }
0x11f3   :  { %v2358_v59 = vpop.eup %2357 }
0x11f4   :  { %v1378_v60 = vmul.f32 2.0, %v2358_v59  ;;  %v1380_v9 = vmul.f32 %v2358_v59, %v2771_v19 }
0x11f6   :  { %v1946_v61 = vadd.f32 -1.0, %v1378_v60 }
0x11f8   :  { %1382 = vrot.lane.b32.xlu0 %v1946_v61, %s2389_s3 }
0x11fa   :  { %v2360_v62 = vpop.eup %2359 }
0x11fb   :  { %v1400_v63 = vadd.f32 1.0, %v2360_v62 }
0x11fd   :  { %2361 = vrcp.f32 %v1400_v63 }
0x1207   :  { %v2362_v0 = vpop.eup %2361 }
0x1208   :  { %v1403_v25 = vmul.f32 2.0, %v2362_v0  ;;  %v1405_v12 = vmul.f32 %v2362_v0, %v2776_v27 }
0x120a   :  { %v1948_v1 = vadd.f32 -1.0, %v1403_v25 }
0x120c   :  { %1407 = vrot.lane.b32.xlu1 %v1948_v1, %s2389_s3 }
0x126a   :  { %v1383_v2 = vpop.permute.xlu0 %1382 }
0x126b   :  { %v1385_v4 = vmul.f32 %v2358_v59, %v1383_v2 }
0x126d   :  { %1387 = vrot.lane.b32.xlu0 %v1385_v4, %s2390_s22 }
0x127e   :  { %v1408_v18 = vpop.permute.xlu1 %1407 }
0x127f   :  { %v1410_v5 = vmul.f32 %v2362_v0, %v1408_v18 }
0x1281   :  { %1412 = vrot.lane.b32.xlu1 %v1410_v5, %s2390_s22 }
0x12df   :  { %v1388_v10 = vpop.permute.xlu0 %1387 }
0x12e0   :  { %v2814_v11 = vadd.f32 %v1388_v10, %v1380_v9 }
0x12e2   :  { %2363 = vtanh.f32 %v2814_v11 }
0x12ec   :  { %v2364_v23 = vpop.eup %2363 }
0x12ed   :  { %1393 = vrot.lane.b32.xlu0 %v2364_v23, %s2389_s3 }
0x12f3   :  { %v1413_v13 = vpop.permute.xlu1 %1412 }
0x12f4   :  { %v2819_v15 = vadd.f32 %v1413_v13, %v1405_v12 }
0x12f6   :  { %2365 = vtanh.f32 %v2819_v15 }
0x1300   :  { %v2366_v16 = vpop.eup %2365 }
0x1301   :  { %1418 = vrot.lane.b32.xlu1 %v2366_v16, %s2389_s3 }
0x135f   :  { %v1394_v17 = vpop.permute.xlu0 %1393 }
0x1360   :  { %v1396_v19 = vmul.f32 %v2358_v59, %v1394_v17 }
0x1362   :  { %v1422_v20 = vpack.c.bf16 %v1396_v19, %v1396_v19 }
0x1364   :  { %1425 = vrot.lane.b32.xlu0 %v1422_v20, %s2390_s22 }
0x1373   :  { %v1419_v22 = vpop.permute.xlu1 %1418 }
0x1374   :  { %v2824_v24 = vmul.f32 %v2362_v0, %v1419_v22 }
0x1376   :  { %v1423_v28 = vpack.c.bf16 %v2824_v24, %v2824_v24 }
0x1378   :  { %1472 = vrot.lane.b32.xlu1 %v1423_v28, %s2390_s22 }
0x13d6   :  { %v1426_v27 = vpop.permute.xlu0 %1425 }
0x13d7   :  { %2220 = vmatmul.mubr.msk.bf16.vlgmr.msra.gmra.mrb[44].mxu1 %vm92_vm0, %v1426_v27 }
0x13d8   :  { %2232 = vmatpush3.bf16.msra.mxu1 %v2563_v54  ;;  %2235 = vmatprep.mubr.msk.bf16.mxu1 %vm2388_vm1, %v2387_v7 }
0x13d9   :  { %2233 = vmatprep.subr.bf16.mxu1 %v2387_v7 }
0x13dc   :  { %2234 = vmatpush3.bf16.msra.mxu1 %v2570_v56 }
0x13dd   :  { %2247 = vmatprep.subr.bf16.mxu1 %v2387_v7 }
0x13df   :  { %2236 = vmatmul.mubr.msk.bf16.vlgmr.msra.gmra.mrb[48].mxu1 %vm92_vm0, %v1426_v27  ;;  %v2386_v27 = vld [vmem:[%s2950_s6] ss:$0 sm:$0xff] }
0x13e0   :  { %2248 = vmatpush3.bf16.msra.mxu1 %v2563_v54  ;;  %2251 = vmatprep.mubr.msk.bf16.mxu1 %vm2388_vm1, %v2387_v7 }
0x13e1   :  { %2249 = vmatprep.subr.bf16.mxu1 %v2387_v7 }
0x13e4   :  { %2250 = vmatpush3.bf16.msra.mxu1 %v2570_v56 }
0x13ea   :  { %v1473_v29 = vpop.permute.xlu1 %1472 }
0x13eb   :  { %2228 = vmatmul.mubr.msk.bf16.vlgmr.msra.gmra.mrb[40].mxu0 %vm92_vm0, %v1473_v29 }
0x13ec   :  { %2240 = vmatpush3.bf16.msra.mxu0 %v2385_v26  ;;  %2243 = vmatprep.mubr.msk.bf16.mxu0 %vm2388_vm1, %v2387_v7 }
0x13ed   :  { %2241 = vmatprep.subr.bf16.mxu0 %v2387_v7 }
0x13f0   :  { %2242 = vmatpush3.bf16.msra.mxu0 %v2545_v48 }
0x14aa   :  { %v1464_v54 = vpop.f32.mrb[44].mxu1 }
0x14ab   :  { %v1470_v32 = vadd.f32 %v1464_v54, %v2517_v21  ;;  %v2221_v33 = vpop.f32.mrb[45].mxu1 }
0x14ac   :  { %v1467_v56 = vpop.f32.mrb[46].mxu1 }
0x14ad   :  { %v1952_v36 = vmul.f32 -1.442695, %v1470_v32  ;;  %v2222_v31 = vpop.f32.mrb[47].mxu1 }
0x14af   :  { %2367 = vpow2.f32 %v1952_v36 }
0x14b2   :  { %v1551_v38 = vpop.f32.mrb[48].mxu1 }
0x14b3   :  { %v2237_v46 = vpop.f32.mrb[49].mxu1 }
0x14b4   :  { %v1554_v40 = vpop.f32.mrb[50].mxu1 }
0x14b5   :  { %v2238_v35 = vpop.f32.mrb[51].mxu1  ;;  %v1728_v40 = vpack.c.bf16 %v2652_v45, %v2609_v50  ;;  %v2288_v50 = vld [vmem:[%s2951_s7 + $0x8] sm:$0xff]  }
0x14b6   :  { %v2287_v35 = vld [vmem:[%s2951_s7] sm:$0xff]  }
0x14b7   :  { %2255 = vmatprep.subr.bf16.mxu0 %v2287_v35 }
0x14b9   :  { %v2368_v42 = vpop.eup %2367 }
0x14ba   :  { %v1561_v39 = vadd.f32 1.0, %v2368_v42  ;;  %v1730_v42 = vpack.c.bf16 %v2824_v24, %v2781_v30 }
0x14bc   :  { %2369 = vrcp.f32 %v1561_v39 }
0x14be   :  { %v1511_v43 = vpop.f32.mrb[40].mxu0 }
0x14bf   :  { %v1552_v44 = vadd.f32 %v1551_v38, %v1511_v43  ;;  %v2229_v7 = vpop.f32.mrb[41].mxu0 }
0x14c0   :  { %v1514_v41 = vpop.f32.mrb[42].mxu0 }
0x14c1   :  { %v1557_v48 = vadd.f32 %v2588_v3, %v1552_v44  ;;  %v2230_v6 = vpop.f32.mrb[43].mxu0  ;;  %v1729_v41 = vpack.c.bf16 %v2738_v34, %v2695_v37 }
0x14c3   :  { %v1954_v21 = vmul.f32 -1.442695, %v1557_v48 }
0x14c5   :  { %2371 = vpow2.f32 %v1954_v21 }
0x14c6   :  { %v2370_v47 = vpop.eup %2369 }
0x14c7   :  { %v1564_v49 = vmul.f32 2.0, %v2370_v47  ;;  %v1566_v60 = vmul.f32 %v2370_v47, %v2814_v11 }
0x14c9   :  { %v1953_v51 = vadd.f32 -1.0, %v1564_v49 }
0x14cb   :  { %1568 = vrot.lane.b32.xlu0 %v1953_v51, %s2389_s3 }
0x14cf   :  { %v2372_v52 = vpop.eup %2371 }
0x14d0   :  { %v1586_v53 = vadd.f32 1.0, %v2372_v52  ;;  %v1960_v52 = vld [vmem:[%s2953_s8] ss:$0 sm:$0xff] }
0x14d2   :  { %2373 = vrcp.f32 %v1586_v53 }
0x14dc   :  { %v2374_v8 = vpop.eup %2373 }
0x14dd   :  { %v1589_v55 = vmul.f32 2.0, %v2374_v8  ;;  %v1591_v0 = vmul.f32 %v2374_v8, %v2819_v15 }
0x14df   :  { %v1955_v57 = vadd.f32 -1.0, %v1589_v55 }
0x14e1   :  { %1593 = vrot.lane.b32.xlu1 %v1955_v57, %s2389_s3 }
0x153d   :  { %v1569_v58 = vpop.permute.xlu0 %1568 }
0x153e   :  { %v1571_v14 = vmul.f32 %v2370_v47, %v1569_v58 }
0x1540   :  { %1573 = vrot.lane.b32.xlu0 %v1571_v14, %s2390_s22 }
0x1553   :  { %v1594_v3 = vpop.permute.xlu1 %1593 }
0x1554   :  { %v1596_v59 = vmul.f32 %v2374_v8, %v1594_v3 }
0x1556   :  { %1598 = vrot.lane.b32.xlu1 %v1596_v59, %s2390_s22 }
0x15b2   :  { %v1574_v61 = vpop.permute.xlu0 %1573 }
0x15b3   :  { %v1576_v62 = vadd.f32 %v1574_v61, %v1566_v60 }
0x15b5   :  { %2375 = vtanh.f32 %v1576_v62 }
0x15bf   :  { %v2376_v63 = vpop.eup %2375 }
0x15c0   :  { %1579 = vrot.lane.b32.xlu0 %v2376_v63, %s2389_s3 }
0x15c8   :  { %v1599_v25 = vpop.permute.xlu1 %1598 }
0x15c9   :  { %v1601_v1 = vadd.f32 %v1599_v25, %v1591_v0 }
0x15cb   :  { %2377 = vtanh.f32 %v1601_v1 }
0x15d5   :  { %v2378_v2 = vpop.eup %2377 }
0x15d6   :  { %1604 = vrot.lane.b32.xlu1 %v2378_v2, %s2389_s3 }
0x1632   :  { %v1580_v4 = vpop.permute.xlu0 %1579 }
0x1633   :  { %v1582_v18 = vmul.f32 %v2370_v47, %v1580_v4 }
0x1635   :  { %v1608_v5 = vpack.c.bf16 %v1582_v18, %v1582_v18 }
0x1637   :  { %1657 = vrot.lane.b32.xlu1 %v1608_v5, %s2390_s22 }
0x1648   :  { %v1605_v9 = vpop.permute.xlu1 %1604 }
0x1649   :  { %v1607_v10 = vmul.f32 %v2374_v8, %v1605_v9 }
0x164b   :  { %v1609_v11 = vpack.c.bf16 %v1607_v10, %v1607_v10 }
0x164d   :  { %1611 = vrot.lane.b32.xlu0 %v1609_v11, %s2390_s22 }
0x16a9   :  { %v1658_v23 = vpop.permute.xlu1 %1657 }
0x16aa   :  { %2252 = vmatmul.mubr.msk.bf16.vlgmr.msra.gmra.mrb[52].mxu1 %vm92_vm0, %v1658_v23 }
0x16bf   :  { %v1612_v12 = vpop.permute.xlu0 %1611 }
0x16c0   :  { %2244 = vmatmul.mubr.msk.bf16.vlgmr.msra.gmra.mrb[44].mxu0 %vm92_vm0, %v1612_v12 }
0x16c1   :  { %2256 = vmatpush3.bf16.msra.mxu0 %v2287_v35 }
0x16c2   :  { %2257 = vmatprep.subr.bf16.mxu0 %v2288_v50 }
0x16c5   :  { %2258 = vmatpush3.bf16.msra.mxu0 %v2288_v50 }
0x177d   :  { %v1696_v13 = vpop.f32.mrb[52].mxu1 }
0x177e   :  { %v2253_v15 = vpop.f32.mrb[53].mxu1 }
0x177f   :  { %v1699_v16 = vpop.f32.mrb[54].mxu1 }
0x1780   :  { %v2254_v17 = vpop.f32.mrb[55].mxu1 }
0x1793   :  { %v1650_v19 = vpop.f32.mrb[44].mxu0 }
0x1794   :  { %v1697_v20 = vadd.f32 %v1696_v13, %v1650_v19  ;;  %v2245_v22 = vpop.f32.mrb[45].mxu0 }
0x1795   :  { %v1653_v28 = vpop.f32.mrb[46].mxu0 }
0x1796   :  { %v1702_v29 = vadd.f32 %v2386_v27, %v1697_v20  ;;  %v2246_v26 = vpop.f32.mrb[47].mxu0 }
0x1798   :  { %v1958_v54 = vmul.f32 -1.442695, %v1702_v29 }
0x179a   :  { %2379 = vpow2.f32 %v1958_v54 }
0x17a4   :  { %v2380_v32 = vpop.eup %2379 }
0x17a5   :  { %v1706_v33 = vadd.f32 1.0, %v2380_v32 }
0x17a7   :  { %2381 = vrcp.f32 %v1706_v33 }
0x17b1   :  { %v2382_v56 = vpop.eup %2381 }
0x17b2   :  { %v1709_v36 = vmul.f32 2.0, %v2382_v56  ;;  %v1711_v39 = vmul.f32 %v2382_v56, %v1601_v1 }
0x17b4   :  { %v1959_v31 = vadd.f32 -1.0, %v1709_v36 }
0x17b6   :  { %1713 = vrot.lane.b32.xlu0 %v1959_v31, %s2389_s3 }
0x1828   :  { %v1714_v38 = vpop.permute.xlu0 %1713 }
0x1829   :  { %v1716_v46 = vmul.f32 %v2382_v56, %v1714_v38 }
0x182b   :  { %1718 = vrot.lane.b32.xlu1 %v1716_v46, %s2390_s22 }
0x182f   :  { %1747 = vrot.lane.b32.xlu1 %v1728_v40, %s2390_s22 }
0x1833   :  { %1751 = vrot.lane.b32.xlu1 %v1730_v42, %s2390_s22 }
0x1837   :  { %1854 = vrot.lane.b32.xlu1 %v1582_v18, %s2390_s22 }
0x183b   :  { %1865 = vrot.lane.b32.xlu1 %v1576_v62, %s2390_s22 }
0x189d   :  { %v1719_v45 = vpop.permute.xlu1 %1718 }
0x189e   :  { %v1721_v43 = vadd.f32 %v1719_v45, %v1711_v39 }
0x18a0   :  { %2383 = vtanh.f32 %v1721_v43 }
0x18a1   :  { %v1748_v44 = vpop.permute.xlu1 %1747 }
0x18a2   :  { %2259 = vmatprep.mubr.msk.bf16.mxu0 %vm92_vm0, %v1748_v44 }
0x18a5   :  { %v1752_v30 = vpop.permute.xlu1 %1751 }
0x18a9   :  { %v1855_v24 = vpop.permute.xlu1 %1854 }
0x18aa   :  { %v2384_v7 = vpop.eup %2383  ;;  %1857 = vst.msk [vmem:[%s2952_s12] sm:$0xff] %vm92_vm0, %v1855_v24 }
0x18ab   :  { %1724 = vrot.lane.b32.xlu0 %v2384_v7, %s2389_s3 }
0x18ad   :  { %v1866_v34 = vpop.permute.xlu1 %1865 }
0x18af   :  { %1749 = vrot.lane.b32.xlu0 %v1729_v41, %s2390_s22 }
0x191d   :  { %v1725_v48 = vpop.permute.xlu0 %1724 }
0x191e   :  { %v1727_v6 = vmul.f32 %v2382_v56, %v1725_v48 }
0x1920   :  { %v1731_v21 = vpack.c.bf16 %v1727_v6, %v1607_v10 }
0x1921   :  { %v1750_v47 = vpop.permute.xlu0 %1749 }
0x1922   :  { %1753 = vrot.lane.b32.xlu0 %v1731_v21, %s2390_s22  ;;  %2260 = vmatmul.mubr.msk.bf16.vlgmr.msra.gmra.mrb[48].mxu0 %vm92_vm0, %v1750_v47 }
0x1923   :  { %2263 = vmatprep.mubr.msk.bf16.mxu0 %vm92_vm0, %v1752_v30 }
0x1926   :  { %1859 = vrot.lane.b32.xlu0 %v1727_v6, %s2389_s3 }
0x192a   :  { %1871 = vrot.lane.b32.xlu0 %v1721_v43, %s2389_s3 }
0x1994   :  { %v1754_v49 = vpop.permute.xlu0 %1753 }
0x1995   :  { %2264 = vmatmul.mubr.msk.bf16.gmra.mrb[52].mxu0 %vm92_vm0, %v1754_v49 }
0x1998   :  { %v1860_v37 = vpop.permute.xlu0 %1859 }
0x1999   :  { %1863 = vst.msk [vmem:[%s2952_s12] sm:$0xff] %vm1862_vm2, %v1860_v37 }
0x199a   :  { %1869 = vst.msk [vmem:[%s2952_s12] sm:$0xff] %vm1868_vm3, %v1866_v34 }
0x199c   :  { %v1872_v51 = vpop.permute.xlu0 %1871 }
0x199d   :  { %1875 = vst.msk [vmem:[%s2952_s12] sm:$0xff] %vm1874_vm4, %v1872_v51 }
0x19f5   :  { %v2261_v53 = vpop.f32.mrb[48].mxu0 }
0x19f6   :  { %v1822_v8 = vadd.f32 %v2261_v53, %v1960_v52  ;;  %v1813_v55 = vpop.f32.mrb[49].mxu0 }
0x19f7   :  { %v1814_v57 = vadd.f32 %v1960_v52, %v1813_v55  ;;  %v2262_v58 = vpop.f32.mrb[50].mxu0 }
0x19f8   :  { %1847 = vst.msk [vmem:[%s2954_s11 + $0x10] sm:$0xff] %vm1844_vm5, %v1822_v8  ;;  %v1825_v14 = vadd.f32 %v2262_v58, %v1960_v52  ;;  %v1816_v3 = vpop.f32.mrb[51].mxu0 }
0x19f9   :  { %1845 = vst.msk [vmem:[%s2954_s11] sm:$0xff] %vm1844_vm5, %v1814_v57  ;;  %v1817_v59 = vadd.f32 %v1960_v52, %v1816_v3 }
0x19fa   :  { %1848 = vst.msk [vmem:[%s2954_s11 + $0x18] sm:$0xff] %vm1844_vm5, %v1825_v14 }
0x19fb   :  { %1846 = vst.msk [vmem:[%s2954_s11 + $0x8] sm:$0xff] %vm1844_vm5, %v1817_v59 }
0x1a68   :  { %v2265_v60 = vpop.f32.mrb[52].mxu0 }
0x1a69   :  { %v1838_v61 = vadd.f32 %v2265_v60, %v1960_v52  ;;  %v1829_v62 = vpop.f32.mrb[53].mxu0 }
0x1a6a   :  { %v1830_v63 = vadd.f32 %v1960_v52, %v1829_v62  ;;  %v2266_v0 = vpop.f32.mrb[54].mxu0 }
0x1a6b   :  { %1851 = vst.msk [vmem:[%s2954_s11 + $0x30] sm:$0xff] %vm1844_vm5, %v1838_v61  ;;  %v1841_v25 = vadd.f32 %v2266_v0, %v1960_v52  ;;  %v1832_v1 = vpop.f32.mrb[55].mxu0 }
0x1a6c   :  { %1849 = vst.msk [vmem:[%s2954_s11 + $0x20] sm:$0xff] %vm1844_vm5, %v1830_v63  ;;  %v1833_v2 = vadd.f32 %v1960_v52, %v1832_v1 }
0x1a6d   :  { %1852 = vst.msk [vmem:[%s2954_s11 + $0x38] sm:$0xff] %vm1844_vm5, %v1841_v25 }
0x1a6e   :  { %1850 = vst.msk [vmem:[%s2954_s11 + $0x28] sm:$0xff] %vm1844_vm5, %v1833_v2 }

</bundles_post_ra>
